<compile_context>
chip_gen: v5e
topology: v5e:2x2
jax: 0.10.0
libtpu: 0.0.40
codegen_flags: <defaults>
</compile_context>

<pallas_src>
import functools

import jax
import jax.numpy as jnp
from jax.experimental import pallas as pl
from jax.experimental.pallas import tpu as pltpu


def _round_up(a, m):
    return (a + m - 1) // m * m


def _gru_rec_kernel(gi_ref, whh_ref, bias_ref, bhn_ref, full_ref, h_ref, *,
                    hp, tt):
    """One grid step == one chunk of `tt` timesteps. Hidden carried in VMEM scratch.

    gi_ref:   (tt, B, 3*hp)  matmul_dtype  precomputed input projection (no bias)
    whh_ref:  (hp, 3*hp)     matmul_dtype  recurrent weights (resident block)
    bias_ref: (1, 3*hp)      f32           [b_ir+b_hr, b_iz+b_hz, b_in]
    bhn_ref:  (1, hp)        f32           recurrent bias of the n gate only
    full_ref: (tt, B, hp)    f32           per-chunk output slab (time-major)
    h_ref:    (B, hp)        f32           hidden-state carry (scratch)
    """

    @pl.when(pl.program_id(0) == 0)
    def _():
        h_ref[...] = jnp.zeros_like(h_ref)

    b_all = bias_ref[...]       # (1, 3hp) f32
    b_hn = bhn_ref[...]         # (1, hp)  f32

    def step(i, h_prev):
        # Off the recurrent critical path: only depends on the loaded gi chunk.
        gi = gi_ref[i].astype(jnp.float32) + b_all                # (B, 3hp)
        gh = jnp.dot(h_prev.astype(whh_ref.dtype), whh_ref[...],
                     preferred_element_type=jnp.float32)          # (B, 3hp)
        # Lane-aligned gate slices (hp is a multiple of 128) -> free views.
        r = jax.nn.sigmoid(gi[:, 0:hp] + gh[:, 0:hp])
        z = jax.nn.sigmoid(gi[:, hp:2 * hp] + gh[:, hp:2 * hp])
        n = jnp.tanh(gi[:, 2 * hp:3 * hp] + r * (gh[:, 2 * hp:3 * hp] + b_hn))
        h_new = n + z * (h_prev - n)
        full_ref[i] = h_new.astype(full_ref.dtype)
        return h_new

    h_ref[...] = jax.lax.fori_loop(0, tt, step, h_ref[...], unroll=True)


@functools.partial(jax.jit, static_argnames=("time_chunk", "matmul_dtype"))
def gru_forward(x, w_ih, w_hh, b_ih, b_hh, *, time_chunk=8,
                matmul_dtype=jnp.bfloat16):
    """x: (B, T, I) float32 (batch_first, like PyTorch).
    w_ih: (3H, I), w_hh: (3H, H), b_ih/b_hh: (3H,).
    Returns (full: (B, T, H), last: (B, 1, H)) == nn.GRU then transpose(h_n,0,1).
    """
    f32 = jnp.float32
    B, T, I = x.shape
    H = w_hh.shape[1]
    Hp = max(_round_up(H, 128), 128)           # lane-aligned per-gate width
    TT = min(int(time_chunk), T)
    Tp = _round_up(T, TT)

    # ---- per-gate zero padding so gate g occupies columns [g*Hp, g*Hp + H) ----
    def pad_gates_out(w):                      # (3H, K) -> (3Hp, K)
        K = w.shape[1]
        wp = jnp.zeros((3 * Hp, K), w.dtype)
        for g in range(3):
            wp = wp.at[g * Hp:g * Hp + H].set(w[g * H:(g + 1) * H])
        return wp

    wih_p = pad_gates_out(w_ih.astype(f32))                        # (3Hp, I)
    whh_g = pad_gates_out(w_hh.astype(f32))                        # (3Hp, H)
    whh_t = jnp.zeros((Hp, 3 * Hp), f32).at[:H, :].set(whh_g.T)    # (Hp, 3Hp)

    b_ihf = b_ih.astype(f32)
    b_hhf = b_hh.astype(f32)
    # Fold b_hr / b_hz into the per-step bias add; keep b_hn separate (it sits
    # inside r * (...)).  Padded columns stay exactly zero.
    b_comb = jnp.zeros((1, 3 * Hp), f32)
    b_comb = b_comb.at[0, 0:H].set(b_ihf[0:H] + b_hhf[0:H])                 # r
    b_comb = b_comb.at[0, Hp:Hp + H].set(b_ihf[H:2 * H] + b_hhf[H:2 * H])   # z
    b_comb = b_comb.at[0, 2 * Hp:2 * Hp + H].set(b_ihf[2 * H:3 * H])        # n (input)
    b_hn = jnp.zeros((1, Hp), f32).at[0, :H].set(b_hhf[2 * H:3 * H])

    # ---- hoisted input projection: one big matmul for all timesteps ----------
    # Output directly in time-major (T, B, 3Hp); streamed to the kernel in
    # matmul_dtype (bf16 by default) to halve HBM traffic of the big operand.
    gi = jnp.einsum("bti,ik->tbk",
                    x.astype(matmul_dtype),
                    wih_p.T.astype(matmul_dtype),
                    preferred_element_type=f32)                    # (T, B, 3Hp)
    gi = gi.astype(matmul_dtype)
    if Tp != T:
        gi = jnp.concatenate(
            [gi, jnp.zeros((Tp - T, B, 3 * Hp), gi.dtype)], axis=0)

    kernel = functools.partial(_gru_rec_kernel, hp=Hp, tt=TT)

    full_tm = pl.pallas_call(
        kernel,
        out_shape=jax.ShapeDtypeStruct((Tp, B, Hp), f32),
        grid_spec=pltpu.PrefetchScalarGridSpec(
            num_scalar_prefetch=0,
            grid=(Tp // TT,),
            in_specs=[
                pl.BlockSpec((TT, B, 3 * Hp), lambda c: (c, 0, 0)),  # gi chunk
                pl.BlockSpec((Hp, 3 * Hp), lambda c: (0, 0)),        # W_hh^T (resident)
                pl.BlockSpec((1, 3 * Hp), lambda c: (0, 0)),         # combined bias
                pl.BlockSpec((1, Hp), lambda c: (0, 0)),             # b_hn
            ],
            out_specs=pl.BlockSpec((TT, B, Hp), lambda c: (c, 0, 0)),
            scratch_shapes=[pltpu.VMEM((B, Hp), f32)],               # hidden carry
        ),
        compiler_params=pltpu.CompilerParams(
            dimension_semantics=("arbitrary",),      # sequential over time chunks
            vmem_limit_bytes=48 * 1024 * 1024),
    )(gi, whh_t.astype(matmul_dtype), b_comb, b_hn)

    # One fused relayout: drop time/hidden padding and go batch-first.
    full = jnp.transpose(full_tm[:T, :, :H], (1, 0, 2)).astype(x.dtype)  # (B, T, H)
    last = full[:, T - 1:T, :]                                           # (B, 1, H)
    return full, last


def _gru_reference(x, w_ih, w_hh, b_ih, b_hh):
    """Pure-JAX reference (PyTorch GRU semantics) for verification."""
    B, T, I = x.shape
    H = w_hh.shape[1]
    h = jnp.zeros((B, H), jnp.float32)
    outs = []
    for t in range(T):
        gi = x[:, t, :] @ w_ih.T + b_ih
        gh = h @ w_hh.T + b_hh
        i_r, i_z, i_n = gi[:, :H], gi[:, H:2 * H], gi[:, 2 * H:]
        h_r, h_z, h_n = gh[:, :H], gh[:, H:2 * H], gh[:, 2 * H:]
        r = jax.nn.sigmoid(i_r + h_r)
        z = jax.nn.sigmoid(i_z + h_z)
        n = jnp.tanh(i_n + r * h_n)
        h = (1.0 - z) * n + z * h
        outs.append(h)
    full = jnp.stack(outs, axis=1)
    return full, h.reshape(B, 1, H)


if __name__ == "__main__":
    key = jax.random.PRNGKey(0)

    def make(B, T, I, H, k):
        kx, k1, k2, k3, k4 = jax.random.split(k, 5)
        bound = 1.0 / float(H) ** 0.5      # matches PyTorch GRU uniform init range
        x = jax.random.normal(kx, (B, T, I), jnp.float32)
        w_ih = jax.random.uniform(k1, (3 * H, I), jnp.float32, -bound, bound)
        w_hh = jax.random.uniform(k2, (3 * H, H), jnp.float32, -bound, bound)
        b_ih = jax.random.uniform(k3, (3 * H,), jnp.float32, -bound, bound)
        b_hh = jax.random.uniform(k4, (3 * H,), jnp.float32, -bound, bound)
        return x, w_ih, w_hh, b_ih, b_hh

    # Case 1: exact f32 matmul path, T a multiple of the time chunk.
    args = make(2, 8, 16, 32, jax.random.fold_in(key, 0))
    full, last = gru_forward(*args, matmul_dtype=jnp.float32)
    jax.block_until_ready((full, last))
    ref_full, ref_last = _gru_reference(*args)
    assert full.shape == (2, 8, 32) and last.shape == (2, 1, 32)
    assert jnp.allclose(full, ref_full, atol=1e-4, rtol=1e-4)
    assert jnp.allclose(last, ref_last, atol=1e-4, rtol=1e-4)

    # Case 2: default bf16 matmuls (f32 accumulation), T not a multiple of chunk.
    args = make(2, 11, 16, 32, jax.random.fold_in(key, 1))
    full, last = gru_forward(*args)
    jax.block_until_ready((full, last))
    ref_full, ref_last = _gru_reference(*args)
    assert full.shape == (2, 11, 32) and last.shape == (2, 1, 32)
    assert jnp.allclose(full, ref_full, atol=3e-2, rtol=3e-2)
    assert jnp.allclose(last, ref_last, atol=3e-2, rtol=3e-2)

    print("KERNEL_OK")
</pallas_src>

<mosaic_0001>
module attributes {stable_mosaic.version = 11 : i64} {
  func.func @_gru_rec_kernel(%arg0: i32, %arg1: memref<8x2x384xf32, #tpu.memory_space<vmem>>, %arg2: memref<128x384xf32, #tpu.memory_space<vmem>>, %arg3: memref<1x384xf32, #tpu.memory_space<vmem>>, %arg4: memref<1x128xf32, #tpu.memory_space<vmem>>, %arg5: memref<8x2x128xf32, #tpu.memory_space<vmem>>, %arg6: memref<2x128xf32, #tpu.memory_space<vmem>>) attributes {dimension_semantics = [#tpu.dimension_semantics<arbitrary>], iteration_bounds = array<i64: 1>, scalar_prefetch = 0 : i64, scratch_operands = 1 : i64, tpu.core_type = #tpu.core_type<tc>, window_params = [{transform_indices = @transform_0, window_bounds = array<i64: 8, 2, 384>}, {pipeline_mode = #tpu.pipeline_mode<synchronous>, transform_indices = @transform_1, window_bounds = array<i64: 128, 384>}, {pipeline_mode = #tpu.pipeline_mode<synchronous>, transform_indices = @transform_2, window_bounds = array<i64: 1, 384>}, {pipeline_mode = #tpu.pipeline_mode<synchronous>, transform_indices = @transform_3, window_bounds = array<i64: 1, 128>}, {transform_indices = @transform_4, window_bounds = array<i64: 8, 2, 128>}]} {
    %c0_i32 = arith.constant 0 : i32
    %0 = arith.cmpi eq, %arg0, %c0_i32 : i32
    %1 = arith.extui %0 : i1 to i32
    %c0_i32_0 = arith.constant 0 : i32
    %2 = arith.cmpi ne, %1, %c0_i32_0 : i32
    scf.if %2 {
      %cst_80 = arith.constant 0.000000e+00 : f32
      %303 = vector.broadcast %cst_80 : f32 to vector<2x128xf32>
      %c0_81 = arith.constant 0 : index
      %c0_82 = arith.constant 0 : index
      %304 = vector.load %arg6[%c0_81, %c0_82] : memref<2x128xf32, #tpu.memory_space<vmem>>, vector<2x128xf32>
      tpu.vector_store %arg6[%c0_81, %c0_82], %303 {strides = array<i32>} : memref<2x128xf32, #tpu.memory_space<vmem>>, vector<2x128xf32>,
    } else {
    }
    %c0 = arith.constant 0 : index
    %c0_1 = arith.constant 0 : index
    %3 = vector.load %arg3[%c0, %c0_1] : memref<1x384xf32, #tpu.memory_space<vmem>>, vector<1x384xf32>
    %c0_2 = arith.constant 0 : index
    %c0_3 = arith.constant 0 : index
    %4 = vector.load %arg4[%c0_2, %c0_3] : memref<1x128xf32, #tpu.memory_space<vmem>>, vector<1x128xf32>
    %c0_4 = arith.constant 0 : index
    %c0_5 = arith.constant 0 : index
    %5 = vector.load %arg6[%c0_4, %c0_5] : memref<2x128xf32, #tpu.memory_space<vmem>>, vector<2x128xf32>
    %c0_i32_6 = arith.constant 0 : i32
    %6 = arith.index_cast %c0_i32_6 : i32 to index
    %c0_7 = arith.constant 0 : index
    %c0_8 = arith.constant 0 : index
    %7 = vector.load %arg1[%6, %c0_7, %c0_8] : memref<8x2x384xf32, #tpu.memory_space<vmem>>, vector<1x2x384xf32>
    %8 = vector.shape_cast %7 : vector<1x2x384xf32> to vector<2x384xf32>
    %9 = vector.broadcast %3 : vector<1x384xf32> to vector<2x384xf32>
    %10 = arith.addf %8, %9 : vector<2x384xf32>
    %c0_9 = arith.constant 0 : index
    %c0_10 = arith.constant 0 : index
    %11 = vector.load %arg2[%c0_9, %c0_10] : memref<128x384xf32, #tpu.memory_space<vmem>>, vector<128x384xf32>
    %cst = arith.constant dense<0.000000e+00> : vector<2x384xf32>
    %12 = tpu.matmul %5, %11, %cst {dimension_numbers = #tpu.dot_dimension_numbers<[1], [0], [0], [1], [0, 0, 1, 1], [], []>} : vector<2x128xf32>, vector<128x384xf32>, vector<2x384xf32> -> vector<2x384xf32>
    %13 = vector.extract_strided_slice %10 {offsets = [0, 0], sizes = [2, 128], strides = [1, 1]} : vector<2x384xf32> to vector<2x128xf32>
    %14 = vector.extract_strided_slice %12 {offsets = [0, 0], sizes = [2, 128], strides = [1, 1]} : vector<2x384xf32> to vector<2x128xf32>
    %15 = arith.addf %13, %14 : vector<2x128xf32>
    %16 = arith.negf %15 : vector<2x128xf32>
    %17 = math.exp %16 : vector<2x128xf32>
    %cst_11 = arith.constant 1.000000e+00 : f32
    %18 = vector.broadcast %cst_11 : f32 to vector<2x128xf32>
    %19 = arith.addf %18, %17 : vector<2x128xf32>
    %20 = arith.divf %18, %19 : vector<2x128xf32>
    %21 = vector.extract_strided_slice %10 {offsets = [0, 128], sizes = [2, 128], strides = [1, 1]} : vector<2x384xf32> to vector<2x128xf32>
    %22 = vector.extract_strided_slice %12 {offsets = [0, 128], sizes = [2, 128], strides = [1, 1]} : vector<2x384xf32> to vector<2x128xf32>
    %23 = arith.addf %21, %22 : vector<2x128xf32>
    %24 = arith.negf %23 : vector<2x128xf32>
    %25 = math.exp %24 : vector<2x128xf32>
    %cst_12 = arith.constant 1.000000e+00 : f32
    %26 = vector.broadcast %cst_12 : f32 to vector<2x128xf32>
    %27 = arith.addf %26, %25 : vector<2x128xf32>
    %28 = arith.divf %26, %27 : vector<2x128xf32>
    %29 = vector.extract_strided_slice %10 {offsets = [0, 256], sizes = [2, 128], strides = [1, 1]} : vector<2x384xf32> to vector<2x128xf32>
    %30 = vector.extract_strided_slice %12 {offsets = [0, 256], sizes = [2, 128], strides = [1, 1]} : vector<2x384xf32> to vector<2x128xf32>
    %31 = vector.broadcast %4 : vector<1x128xf32> to vector<2x128xf32>
    %32 = arith.addf %30, %31 : vector<2x128xf32>
    %33 = arith.mulf %20, %32 : vector<2x128xf32>
    %34 = arith.addf %29, %33 : vector<2x128xf32>
    %35 = math.tanh %34 : vector<2x128xf32>
    %36 = arith.subf %5, %35 : vector<2x128xf32>
    %37 = arith.mulf %28, %36 : vector<2x128xf32>
    %38 = arith.addf %35, %37 : vector<2x128xf32>
    %39 = arith.index_cast %c0_i32_6 : i32 to index
    %c0_13 = arith.constant 0 : index
    %c0_14 = arith.constant 0 : index
    %40 = vector.load %arg5[%39, %c0_13, %c0_14] : memref<8x2x128xf32, #tpu.memory_space<vmem>>, vector<1x2x128xf32>
    %41 = vector.shape_cast %40 : vector<1x2x128xf32> to vector<2x128xf32>
    %42 = vector.shape_cast %38 : vector<2x128xf32> to vector<1x2x128xf32>
    tpu.vector_store %arg5[%39, %c0_13, %c0_14], %42 {strides = array<i32>} : memref<8x2x128xf32, #tpu.memory_space<vmem>>, vector<1x2x128xf32>,
    %c1_i32 = arith.constant 1 : i32
    %43 = arith.index_cast %c1_i32 : i32 to index
    %c0_15 = arith.constant 0 : index
    %c0_16 = arith.constant 0 : index
    %44 = vector.load %arg1[%43, %c0_15, %c0_16] : memref<8x2x384xf32, #tpu.memory_space<vmem>>, vector<1x2x384xf32>
    %45 = vector.shape_cast %44 : vector<1x2x384xf32> to vector<2x384xf32>
    %46 = vector.broadcast %3 : vector<1x384xf32> to vector<2x384xf32>
    %47 = arith.addf %45, %46 : vector<2x384xf32>
    %c0_17 = arith.constant 0 : index
    %c0_18 = arith.constant 0 : index
    %48 = vector.load %arg2[%c0_17, %c0_18] : memref<128x384xf32, #tpu.memory_space<vmem>>, vector<128x384xf32>
    %cst_19 = arith.constant dense<0.000000e+00> : vector<2x384xf32>
    %49 = tpu.matmul %38, %48, %cst_19 {dimension_numbers = #tpu.dot_dimension_numbers<[1], [0], [0], [1], [0, 0, 1, 1], [], []>} : vector<2x128xf32>, vector<128x384xf32>, vector<2x384xf32> -> vector<2x384xf32>
    %50 = vector.extract_strided_slice %47 {offsets = [0, 0], sizes = [2, 128], strides = [1, 1]} : vector<2x384xf32> to vector<2x128xf32>
    %51 = vector.extract_strided_slice %49 {offsets = [0, 0], sizes = [2, 128], strides = [1, 1]} : vector<2x384xf32> to vector<2x128xf32>
    %52 = arith.addf %50, %51 : vector<2x128xf32>
    %53 = arith.negf %52 : vector<2x128xf32>
    %54 = math.exp %53 : vector<2x128xf32>
    %cst_20 = arith.constant 1.000000e+00 : f32
    %55 = vector.broadcast %cst_20 : f32 to vector<2x128xf32>
    %56 = arith.addf %55, %54 : vector<2x128xf32>
    %57 = arith.divf %55, %56 : vector<2x128xf32>
    %58 = vector.extract_strided_slice %47 {offsets = [0, 128], sizes = [2, 128], strides = [1, 1]} : vector<2x384xf32> to vector<2x128xf32>
    %59 = vector.extract_strided_slice %49 {offsets = [0, 128], sizes = [2, 128], strides = [1, 1]} : vector<2x384xf32> to vector<2x128xf32>
    %60 = arith.addf %58, %59 : vector<2x128xf32>
    %61 = arith.negf %60 : vector<2x128xf32>
    %62 = math.exp %61 : vector<2x128xf32>
    %cst_21 = arith.constant 1.000000e+00 : f32
    %63 = vector.broadcast %cst_21 : f32 to vector<2x128xf32>
    %64 = arith.addf %63, %62 : vector<2x128xf32>
    %65 = arith.divf %63, %64 : vector<2x128xf32>
    %66 = vector.extract_strided_slice %47 {offsets = [0, 256], sizes = [2, 128], strides = [1, 1]} : vector<2x384xf32> to vector<2x128xf32>
    %67 = vector.extract_strided_slice %49 {offsets = [0, 256], sizes = [2, 128], strides = [1, 1]} : vector<2x384xf32> to vector<2x128xf32>
    %68 = vector.broadcast %4 : vector<1x128xf32> to vector<2x128xf32>
    %69 = arith.addf %67, %68 : vector<2x128xf32>
    %70 = arith.mulf %57, %69 : vector<2x128xf32>
    %71 = arith.addf %66, %70 : vector<2x128xf32>
    %72 = math.tanh %71 : vector<2x128xf32>
    %73 = arith.subf %38, %72 : vector<2x128xf32>
    %74 = arith.mulf %65, %73 : vector<2x128xf32>
    %75 = arith.addf %72, %74 : vector<2x128xf32>
    %76 = arith.index_cast %c1_i32 : i32 to index
    %c0_22 = arith.constant 0 : index
    %c0_23 = arith.constant 0 : index
    %77 = vector.load %arg5[%76, %c0_22, %c0_23] : memref<8x2x128xf32, #tpu.memory_space<vmem>>, vector<1x2x128xf32>
    %78 = vector.shape_cast %77 : vector<1x2x128xf32> to vector<2x128xf32>
    %79 = vector.shape_cast %75 : vector<2x128xf32> to vector<1x2x128xf32>
    tpu.vector_store %arg5[%76, %c0_22, %c0_23], %79 {strides = array<i32>} : memref<8x2x128xf32, #tpu.memory_space<vmem>>, vector<1x2x128xf32>,
    %c2_i32 = arith.constant 2 : i32
    %80 = arith.index_cast %c2_i32 : i32 to index
    %c0_24 = arith.constant 0 : index
    %c0_25 = arith.constant 0 : index
    %81 = vector.load %arg1[%80, %c0_24, %c0_25] : memref<8x2x384xf32, #tpu.memory_space<vmem>>, vector<1x2x384xf32>
    %82 = vector.shape_cast %81 : vector<1x2x384xf32> to vector<2x384xf32>
    %83 = vector.broadcast %3 : vector<1x384xf32> to vector<2x384xf32>
    %84 = arith.addf %82, %83 : vector<2x384xf32>
    %c0_26 = arith.constant 0 : index
    %c0_27 = arith.constant 0 : index
    %85 = vector.load %arg2[%c0_26, %c0_27] : memref<128x384xf32, #tpu.memory_space<vmem>>, vector<128x384xf32>
    %cst_28 = arith.constant dense<0.000000e+00> : vector<2x384xf32>
    %86 = tpu.matmul %75, %85, %cst_28 {dimension_numbers = #tpu.dot_dimension_numbers<[1], [0], [0], [1], [0, 0, 1, 1], [], []>} : vector<2x128xf32>, vector<128x384xf32>, vector<2x384xf32> -> vector<2x384xf32>
    %87 = vector.extract_strided_slice %84 {offsets = [0, 0], sizes = [2, 128], strides = [1, 1]} : vector<2x384xf32> to vector<2x128xf32>
    %88 = vector.extract_strided_slice %86 {offsets = [0, 0], sizes = [2, 128], strides = [1, 1]} : vector<2x384xf32> to vector<2x128xf32>
    %89 = arith.addf %87, %88 : vector<2x128xf32>
    %90 = arith.negf %89 : vector<2x128xf32>
    %91 = math.exp %90 : vector<2x128xf32>
    %cst_29 = arith.constant 1.000000e+00 : f32
    %92 = vector.broadcast %cst_29 : f32 to vector<2x128xf32>
    %93 = arith.addf %92, %91 : vector<2x128xf32>
    %94 = arith.divf %92, %93 : vector<2x128xf32>
    %95 = vector.extract_strided_slice %84 {offsets = [0, 128], sizes = [2, 128], strides = [1, 1]} : vector<2x384xf32> to vector<2x128xf32>
    %96 = vector.extract_strided_slice %86 {offsets = [0, 128], sizes = [2, 128], strides = [1, 1]} : vector<2x384xf32> to vector<2x128xf32>
    %97 = arith.addf %95, %96 : vector<2x128xf32>
    %98 = arith.negf %97 : vector<2x128xf32>
    %99 = math.exp %98 : vector<2x128xf32>
    %cst_30 = arith.constant 1.000000e+00 : f32
    %100 = vector.broadcast %cst_30 : f32 to vector<2x128xf32>
    %101 = arith.addf %100, %99 : vector<2x128xf32>
    %102 = arith.divf %100, %101 : vector<2x128xf32>
    %103 = vector.extract_strided_slice %84 {offsets = [0, 256], sizes = [2, 128], strides = [1, 1]} : vector<2x384xf32> to vector<2x128xf32>
    %104 = vector.extract_strided_slice %86 {offsets = [0, 256], sizes = [2, 128], strides = [1, 1]} : vector<2x384xf32> to vector<2x128xf32>
    %105 = vector.broadcast %4 : vector<1x128xf32> to vector<2x128xf32>
    %106 = arith.addf %104, %105 : vector<2x128xf32>
    %107 = arith.mulf %94, %106 : vector<2x128xf32>
    %108 = arith.addf %103, %107 : vector<2x128xf32>
    %109 = math.tanh %108 : vector<2x128xf32>
    %110 = arith.subf %75, %109 : vector<2x128xf32>
    %111 = arith.mulf %102, %110 : vector<2x128xf32>
    %112 = arith.addf %109, %111 : vector<2x128xf32>
    %113 = arith.index_cast %c2_i32 : i32 to index
    %c0_31 = arith.constant 0 : index
    %c0_32 = arith.constant 0 : index
    %114 = vector.load %arg5[%113, %c0_31, %c0_32] : memref<8x2x128xf32, #tpu.memory_space<vmem>>, vector<1x2x128xf32>
    %115 = vector.shape_cast %114 : vector<1x2x128xf32> to vector<2x128xf32>
    %116 = vector.shape_cast %112 : vector<2x128xf32> to vector<1x2x128xf32>
    tpu.vector_store %arg5[%113, %c0_31, %c0_32], %116 {strides = array<i32>} : memref<8x2x128xf32, #tpu.memory_space<vmem>>, vector<1x2x128xf32>,
    %c3_i32 = arith.constant 3 : i32
    %117 = arith.index_cast %c3_i32 : i32 to index
    %c0_33 = arith.constant 0 : index
    %c0_34 = arith.constant 0 : index
    %118 = vector.load %arg1[%117, %c0_33, %c0_34] : memref<8x2x384xf32, #tpu.memory_space<vmem>>, vector<1x2x384xf32>
    %119 = vector.shape_cast %118 : vector<1x2x384xf32> to vector<2x384xf32>
    %120 = vector.broadcast %3 : vector<1x384xf32> to vector<2x384xf32>
    %121 = arith.addf %119, %120 : vector<2x384xf32>
    %c0_35 = arith.constant 0 : index
    %c0_36 = arith.constant 0 : index
    %122 = vector.load %arg2[%c0_35, %c0_36] : memref<128x384xf32, #tpu.memory_space<vmem>>, vector<128x384xf32>
    %cst_37 = arith.constant dense<0.000000e+00> : vector<2x384xf32>
    %123 = tpu.matmul %112, %122, %cst_37 {dimension_numbers = #tpu.dot_dimension_numbers<[1], [0], [0], [1], [0, 0, 1, 1], [], []>} : vector<2x128xf32>, vector<128x384xf32>, vector<2x384xf32> -> vector<2x384xf32>
    %124 = vector.extract_strided_slice %121 {offsets = [0, 0], sizes = [2, 128], strides = [1, 1]} : vector<2x384xf32> to vector<2x128xf32>
    %125 = vector.extract_strided_slice %123 {offsets = [0, 0], sizes = [2, 128], strides = [1, 1]} : vector<2x384xf32> to vector<2x128xf32>
    %126 = arith.addf %124, %125 : vector<2x128xf32>
    %127 = arith.negf %126 : vector<2x128xf32>
    %128 = math.exp %127 : vector<2x128xf32>
    %cst_38 = arith.constant 1.000000e+00 : f32
    %129 = vector.broadcast %cst_38 : f32 to vector<2x128xf32>
    %130 = arith.addf %129, %128 : vector<2x128xf32>
    %131 = arith.divf %129, %130 : vector<2x128xf32>
    %132 = vector.extract_strided_slice %121 {offsets = [0, 128], sizes = [2, 128], strides = [1, 1]} : vector<2x384xf32> to vector<2x128xf32>
    %133 = vector.extract_strided_slice %123 {offsets = [0, 128], sizes = [2, 128], strides = [1, 1]} : vector<2x384xf32> to vector<2x128xf32>
    %134 = arith.addf %132, %133 : vector<2x128xf32>
    %135 = arith.negf %134 : vector<2x128xf32>
    %136 = math.exp %135 : vector<2x128xf32>
    %cst_39 = arith.constant 1.000000e+00 : f32
    %137 = vector.broadcast %cst_39 : f32 to vector<2x128xf32>
    %138 = arith.addf %137, %136 : vector<2x128xf32>
    %139 = arith.divf %137, %138 : vector<2x128xf32>
    %140 = vector.extract_strided_slice %121 {offsets = [0, 256], sizes = [2, 128], strides = [1, 1]} : vector<2x384xf32> to vector<2x128xf32>
    %141 = vector.extract_strided_slice %123 {offsets = [0, 256], sizes = [2, 128], strides = [1, 1]} : vector<2x384xf32> to vector<2x128xf32>
    %142 = vector.broadcast %4 : vector<1x128xf32> to vector<2x128xf32>
    %143 = arith.addf %141, %142 : vector<2x128xf32>
    %144 = arith.mulf %131, %143 : vector<2x128xf32>
    %145 = arith.addf %140, %144 : vector<2x128xf32>
    %146 = math.tanh %145 : vector<2x128xf32>
    %147 = arith.subf %112, %146 : vector<2x128xf32>
    %148 = arith.mulf %139, %147 : vector<2x128xf32>
    %149 = arith.addf %146, %148 : vector<2x128xf32>
    %150 = arith.index_cast %c3_i32 : i32 to index
    %c0_40 = arith.constant 0 : index
    %c0_41 = arith.constant 0 : index
    %151 = vector.load %arg5[%150, %c0_40, %c0_41] : memref<8x2x128xf32, #tpu.memory_space<vmem>>, vector<1x2x128xf32>
    %152 = vector.shape_cast %151 : vector<1x2x128xf32> to vector<2x128xf32>
    %153 = vector.shape_cast %149 : vector<2x128xf32> to vector<1x2x128xf32>
    tpu.vector_store %arg5[%150, %c0_40, %c0_41], %153 {strides = array<i32>} : memref<8x2x128xf32, #tpu.memory_space<vmem>>, vector<1x2x128xf32>,
    %c4_i32 = arith.constant 4 : i32
    %154 = arith.index_cast %c4_i32 : i32 to index
    %c0_42 = arith.constant 0 : index
    %c0_43 = arith.constant 0 : index
    %155 = vector.load %arg1[%154, %c0_42, %c0_43] : memref<8x2x384xf32, #tpu.memory_space<vmem>>, vector<1x2x384xf32>
    %156 = vector.shape_cast %155 : vector<1x2x384xf32> to vector<2x384xf32>
    %157 = vector.broadcast %3 : vector<1x384xf32> to vector<2x384xf32>
    %158 = arith.addf %156, %157 : vector<2x384xf32>
    %c0_44 = arith.constant 0 : index
    %c0_45 = arith.constant 0 : index
    %159 = vector.load %arg2[%c0_44, %c0_45] : memref<128x384xf32, #tpu.memory_space<vmem>>, vector<128x384xf32>
    %cst_46 = arith.constant dense<0.000000e+00> : vector<2x384xf32>
    %160 = tpu.matmul %149, %159, %cst_46 {dimension_numbers = #tpu.dot_dimension_numbers<[1], [0], [0], [1], [0, 0, 1, 1], [], []>} : vector<2x128xf32>, vector<128x384xf32>, vector<2x384xf32> -> vector<2x384xf32>
    %161 = vector.extract_strided_slice %158 {offsets = [0, 0], sizes = [2, 128], strides = [1, 1]} : vector<2x384xf32> to vector<2x128xf32>
    %162 = vector.extract_strided_slice %160 {offsets = [0, 0], sizes = [2, 128], strides = [1, 1]} : vector<2x384xf32> to vector<2x128xf32>
    %163 = arith.addf %161, %162 : vector<2x128xf32>
    %164 = arith.negf %163 : vector<2x128xf32>
    %165 = math.exp %164 : vector<2x128xf32>
    %cst_47 = arith.constant 1.000000e+00 : f32
    %166 = vector.broadcast %cst_47 : f32 to vector<2x128xf32>
    %167 = arith.addf %166, %165 : vector<2x128xf32>
    %168 = arith.divf %166, %167 : vector<2x128xf32>
    %169 = vector.extract_strided_slice %158 {offsets = [0, 128], sizes = [2, 128], strides = [1, 1]} : vector<2x384xf32> to vector<2x128xf32>
    %170 = vector.extract_strided_slice %160 {offsets = [0, 128], sizes = [2, 128], strides = [1, 1]} : vector<2x384xf32> to vector<2x128xf32>
    %171 = arith.addf %169, %170 : vector<2x128xf32>
    %172 = arith.negf %171 : vector<2x128xf32>
    %173 = math.exp %172 : vector<2x128xf32>
    %cst_48 = arith.constant 1.000000e+00 : f32
    %174 = vector.broadcast %cst_48 : f32 to vector<2x128xf32>
    %175 = arith.addf %174, %173 : vector<2x128xf32>
    %176 = arith.divf %174, %175 : vector<2x128xf32>
    %177 = vector.extract_strided_slice %158 {offsets = [0, 256], sizes = [2, 128], strides = [1, 1]} : vector<2x384xf32> to vector<2x128xf32>
    %178 = vector.extract_strided_slice %160 {offsets = [0, 256], sizes = [2, 128], strides = [1, 1]} : vector<2x384xf32> to vector<2x128xf32>
    %179 = vector.broadcast %4 : vector<1x128xf32> to vector<2x128xf32>
    %180 = arith.addf %178, %179 : vector<2x128xf32>
    %181 = arith.mulf %168, %180 : vector<2x128xf32>
    %182 = arith.addf %177, %181 : vector<2x128xf32>
    %183 = math.tanh %182 : vector<2x128xf32>
    %184 = arith.subf %149, %183 : vector<2x128xf32>
    %185 = arith.mulf %176, %184 : vector<2x128xf32>
    %186 = arith.addf %183, %185 : vector<2x128xf32>
    %187 = arith.index_cast %c4_i32 : i32 to index
    %c0_49 = arith.constant 0 : index
    %c0_50 = arith.constant 0 : index
    %188 = vector.load %arg5[%187, %c0_49, %c0_50] : memref<8x2x128xf32, #tpu.memory_space<vmem>>, vector<1x2x128xf32>
    %189 = vector.shape_cast %188 : vector<1x2x128xf32> to vector<2x128xf32>
    %190 = vector.shape_cast %186 : vector<2x128xf32> to vector<1x2x128xf32>
    tpu.vector_store %arg5[%187, %c0_49, %c0_50], %190 {strides = array<i32>} : memref<8x2x128xf32, #tpu.memory_space<vmem>>, vector<1x2x128xf32>,
    %c5_i32 = arith.constant 5 : i32
    %191 = arith.index_cast %c5_i32 : i32 to index
    %c0_51 = arith.constant 0 : index
    %c0_52 = arith.constant 0 : index
    %192 = vector.load %arg1[%191, %c0_51, %c0_52] : memref<8x2x384xf32, #tpu.memory_space<vmem>>, vector<1x2x384xf32>
    %193 = vector.shape_cast %192 : vector<1x2x384xf32> to vector<2x384xf32>
    %194 = vector.broadcast %3 : vector<1x384xf32> to vector<2x384xf32>
    %195 = arith.addf %193, %194 : vector<2x384xf32>
    %c0_53 = arith.constant 0 : index
    %c0_54 = arith.constant 0 : index
    %196 = vector.load %arg2[%c0_53, %c0_54] : memref<128x384xf32, #tpu.memory_space<vmem>>, vector<128x384xf32>
    %cst_55 = arith.constant dense<0.000000e+00> : vector<2x384xf32>
    %197 = tpu.matmul %186, %196, %cst_55 {dimension_numbers = #tpu.dot_dimension_numbers<[1], [0], [0], [1], [0, 0, 1, 1], [], []>} : vector<2x128xf32>, vector<128x384xf32>, vector<2x384xf32> -> vector<2x384xf32>
    %198 = vector.extract_strided_slice %195 {offsets = [0, 0], sizes = [2, 128], strides = [1, 1]} : vector<2x384xf32> to vector<2x128xf32>
    %199 = vector.extract_strided_slice %197 {offsets = [0, 0], sizes = [2, 128], strides = [1, 1]} : vector<2x384xf32> to vector<2x128xf32>
    %200 = arith.addf %198, %199 : vector<2x128xf32>
    %201 = arith.negf %200 : vector<2x128xf32>
    %202 = math.exp %201 : vector<2x128xf32>
    %cst_56 = arith.constant 1.000000e+00 : f32
    %203 = vector.broadcast %cst_56 : f32 to vector<2x128xf32>
    %204 = arith.addf %203, %202 : vector<2x128xf32>
    %205 = arith.divf %203, %204 : vector<2x128xf32>
    %206 = vector.extract_strided_slice %195 {offsets = [0, 128], sizes = [2, 128], strides = [1, 1]} : vector<2x384xf32> to vector<2x128xf32>
    %207 = vector.extract_strided_slice %197 {offsets = [0, 128], sizes = [2, 128], strides = [1, 1]} : vector<2x384xf32> to vector<2x128xf32>
    %208 = arith.addf %206, %207 : vector<2x128xf32>
    %209 = arith.negf %208 : vector<2x128xf32>
    %210 = math.exp %209 : vector<2x128xf32>
    %cst_57 = arith.constant 1.000000e+00 : f32
    %211 = vector.broadcast %cst_57 : f32 to vector<2x128xf32>
    %212 = arith.addf %211, %210 : vector<2x128xf32>
    %213 = arith.divf %211, %212 : vector<2x128xf32>
    %214 = vector.extract_strided_slice %195 {offsets = [0, 256], sizes = [2, 128], strides = [1, 1]} : vector<2x384xf32> to vector<2x128xf32>
    %215 = vector.extract_strided_slice %197 {offsets = [0, 256], sizes = [2, 128], strides = [1, 1]} : vector<2x384xf32> to vector<2x128xf32>
    %216 = vector.broadcast %4 : vector<1x128xf32> to vector<2x128xf32>
    %217 = arith.addf %215, %216 : vector<2x128xf32>
    %218 = arith.mulf %205, %217 : vector<2x128xf32>
    %219 = arith.addf %214, %218 : vector<2x128xf32>
    %220 = math.tanh %219 : vector<2x128xf32>
    %221 = arith.subf %186, %220 : vector<2x128xf32>
    %222 = arith.mulf %213, %221 : vector<2x128xf32>
    %223 = arith.addf %220, %222 : vector<2x128xf32>
    %224 = arith.index_cast %c5_i32 : i32 to index
    %c0_58 = arith.constant 0 : index
    %c0_59 = arith.constant 0 : index
    %225 = vector.load %arg5[%224, %c0_58, %c0_59] : memref<8x2x128xf32, #tpu.memory_space<vmem>>, vector<1x2x128xf32>
    %226 = vector.shape_cast %225 : vector<1x2x128xf32> to vector<2x128xf32>
    %227 = vector.shape_cast %223 : vector<2x128xf32> to vector<1x2x128xf32>
    tpu.vector_store %arg5[%224, %c0_58, %c0_59], %227 {strides = array<i32>} : memref<8x2x128xf32, #tpu.memory_space<vmem>>, vector<1x2x128xf32>,
    %c6_i32 = arith.constant 6 : i32
    %228 = arith.index_cast %c6_i32 : i32 to index
    %c0_60 = arith.constant 0 : index
    %c0_61 = arith.constant 0 : index
    %229 = vector.load %arg1[%228, %c0_60, %c0_61] : memref<8x2x384xf32, #tpu.memory_space<vmem>>, vector<1x2x384xf32>
    %230 = vector.shape_cast %229 : vector<1x2x384xf32> to vector<2x384xf32>
    %231 = vector.broadcast %3 : vector<1x384xf32> to vector<2x384xf32>
    %232 = arith.addf %230, %231 : vector<2x384xf32>
    %c0_62 = arith.constant 0 : index
    %c0_63 = arith.constant 0 : index
    %233 = vector.load %arg2[%c0_62, %c0_63] : memref<128x384xf32, #tpu.memory_space<vmem>>, vector<128x384xf32>
    %cst_64 = arith.constant dense<0.000000e+00> : vector<2x384xf32>
    %234 = tpu.matmul %223, %233, %cst_64 {dimension_numbers = #tpu.dot_dimension_numbers<[1], [0], [0], [1], [0, 0, 1, 1], [], []>} : vector<2x128xf32>, vector<128x384xf32>, vector<2x384xf32> -> vector<2x384xf32>
    %235 = vector.extract_strided_slice %232 {offsets = [0, 0], sizes = [2, 128], strides = [1, 1]} : vector<2x384xf32> to vector<2x128xf32>
    %236 = vector.extract_strided_slice %234 {offsets = [0, 0], sizes = [2, 128], strides = [1, 1]} : vector<2x384xf32> to vector<2x128xf32>
    %237 = arith.addf %235, %236 : vector<2x128xf32>
    %238 = arith.negf %237 : vector<2x128xf32>
    %239 = math.exp %238 : vector<2x128xf32>
    %cst_65 = arith.constant 1.000000e+00 : f32
    %240 = vector.broadcast %cst_65 : f32 to vector<2x128xf32>
    %241 = arith.addf %240, %239 : vector<2x128xf32>
    %242 = arith.divf %240, %241 : vector<2x128xf32>
    %243 = vector.extract_strided_slice %232 {offsets = [0, 128], sizes = [2, 128], strides = [1, 1]} : vector<2x384xf32> to vector<2x128xf32>
    %244 = vector.extract_strided_slice %234 {offsets = [0, 128], sizes = [2, 128], strides = [1, 1]} : vector<2x384xf32> to vector<2x128xf32>
    %245 = arith.addf %243, %244 : vector<2x128xf32>
    %246 = arith.negf %245 : vector<2x128xf32>
    %247 = math.exp %246 : vector<2x128xf32>
    %cst_66 = arith.constant 1.000000e+00 : f32
    %248 = vector.broadcast %cst_66 : f32 to vector<2x128xf32>
    %249 = arith.addf %248, %247 : vector<2x128xf32>
    %250 = arith.divf %248, %249 : vector<2x128xf32>
    %251 = vector.extract_strided_slice %232 {offsets = [0, 256], sizes = [2, 128], strides = [1, 1]} : vector<2x384xf32> to vector<2x128xf32>
    %252 = vector.extract_strided_slice %234 {offsets = [0, 256], sizes = [2, 128], strides = [1, 1]} : vector<2x384xf32> to vector<2x128xf32>
    %253 = vector.broadcast %4 : vector<1x128xf32> to vector<2x128xf32>
    %254 = arith.addf %252, %253 : vector<2x128xf32>
    %255 = arith.mulf %242, %254 : vector<2x128xf32>
    %256 = arith.addf %251, %255 : vector<2x128xf32>
    %257 = math.tanh %256 : vector<2x128xf32>
    %258 = arith.subf %223, %257 : vector<2x128xf32>
    %259 = arith.mulf %250, %258 : vector<2x128xf32>
    %260 = arith.addf %257, %259 : vector<2x128xf32>
    %261 = arith.index_cast %c6_i32 : i32 to index
    %c0_67 = arith.constant 0 : index
    %c0_68 = arith.constant 0 : index
    %262 = vector.load %arg5[%261, %c0_67, %c0_68] : memref<8x2x128xf32, #tpu.memory_space<vmem>>, vector<1x2x128xf32>
    %263 = vector.shape_cast %262 : vector<1x2x128xf32> to vector<2x128xf32>
    %264 = vector.shape_cast %260 : vector<2x128xf32> to vector<1x2x128xf32>
    tpu.vector_store %arg5[%261, %c0_67, %c0_68], %264 {strides = array<i32>} : memref<8x2x128xf32, #tpu.memory_space<vmem>>, vector<1x2x128xf32>,
    %c7_i32 = arith.constant 7 : i32
    %265 = arith.index_cast %c7_i32 : i32 to index
    %c0_69 = arith.constant 0 : index
    %c0_70 = arith.constant 0 : index
    %266 = vector.load %arg1[%265, %c0_69, %c0_70] : memref<8x2x384xf32, #tpu.memory_space<vmem>>, vector<1x2x384xf32>
    %267 = vector.shape_cast %266 : vector<1x2x384xf32> to vector<2x384xf32>
    %268 = vector.broadcast %3 : vector<1x384xf32> to vector<2x384xf32>
    %269 = arith.addf %267, %268 : vector<2x384xf32>
    %c0_71 = arith.constant 0 : index
    %c0_72 = arith.constant 0 : index
    %270 = vector.load %arg2[%c0_71, %c0_72] : memref<128x384xf32, #tpu.memory_space<vmem>>, vector<128x384xf32>
    %cst_73 = arith.constant dense<0.000000e+00> : vector<2x384xf32>
    %271 = tpu.matmul %260, %270, %cst_73 {dimension_numbers = #tpu.dot_dimension_numbers<[1], [0], [0], [1], [0, 0, 1, 1], [], []>} : vector<2x128xf32>, vector<128x384xf32>, vector<2x384xf32> -> vector<2x384xf32>
    %272 = vector.extract_strided_slice %269 {offsets = [0, 0], sizes = [2, 128], strides = [1, 1]} : vector<2x384xf32> to vector<2x128xf32>
    %273 = vector.extract_strided_slice %271 {offsets = [0, 0], sizes = [2, 128], strides = [1, 1]} : vector<2x384xf32> to vector<2x128xf32>
    %274 = arith.addf %272, %273 : vector<2x128xf32>
    %275 = arith.negf %274 : vector<2x128xf32>
    %276 = math.exp %275 : vector<2x128xf32>
    %cst_74 = arith.constant 1.000000e+00 : f32
    %277 = vector.broadcast %cst_74 : f32 to vector<2x128xf32>
    %278 = arith.addf %277, %276 : vector<2x128xf32>
    %279 = arith.divf %277, %278 : vector<2x128xf32>
    %280 = vector.extract_strided_slice %269 {offsets = [0, 128], sizes = [2, 128], strides = [1, 1]} : vector<2x384xf32> to vector<2x128xf32>
    %281 = vector.extract_strided_slice %271 {offsets = [0, 128], sizes = [2, 128], strides = [1, 1]} : vector<2x384xf32> to vector<2x128xf32>
    %282 = arith.addf %280, %281 : vector<2x128xf32>
    %283 = arith.negf %282 : vector<2x128xf32>
    %284 = math.exp %283 : vector<2x128xf32>
    %cst_75 = arith.constant 1.000000e+00 : f32
    %285 = vector.broadcast %cst_75 : f32 to vector<2x128xf32>
    %286 = arith.addf %285, %284 : vector<2x128xf32>
    %287 = arith.divf %285, %286 : vector<2x128xf32>
    %288 = vector.extract_strided_slice %269 {offsets = [0, 256], sizes = [2, 128], strides = [1, 1]} : vector<2x384xf32> to vector<2x128xf32>
    %289 = vector.extract_strided_slice %271 {offsets = [0, 256], sizes = [2, 128], strides = [1, 1]} : vector<2x384xf32> to vector<2x128xf32>
    %290 = vector.broadcast %4 : vector<1x128xf32> to vector<2x128xf32>
    %291 = arith.addf %289, %290 : vector<2x128xf32>
    %292 = arith.mulf %279, %291 : vector<2x128xf32>
    %293 = arith.addf %288, %292 : vector<2x128xf32>
    %294 = math.tanh %293 : vector<2x128xf32>
    %295 = arith.subf %260, %294 : vector<2x128xf32>
    %296 = arith.mulf %287, %295 : vector<2x128xf32>
    %297 = arith.addf %294, %296 : vector<2x128xf32>
    %298 = arith.index_cast %c7_i32 : i32 to index
    %c0_76 = arith.constant 0 : index
    %c0_77 = arith.constant 0 : index
    %299 = vector.load %arg5[%298, %c0_76, %c0_77] : memref<8x2x128xf32, #tpu.memory_space<vmem>>, vector<1x2x128xf32>
    %300 = vector.shape_cast %299 : vector<1x2x128xf32> to vector<2x128xf32>
    %301 = vector.shape_cast %297 : vector<2x128xf32> to vector<1x2x128xf32>
    tpu.vector_store %arg5[%298, %c0_76, %c0_77], %301 {strides = array<i32>} : memref<8x2x128xf32, #tpu.memory_space<vmem>>, vector<1x2x128xf32>,
    %c8_i32 = arith.constant 8 : i32
    %c0_78 = arith.constant 0 : index
    %c0_79 = arith.constant 0 : index
    %302 = vector.load %arg6[%c0_78, %c0_79] : memref<2x128xf32, #tpu.memory_space<vmem>>, vector<2x128xf32>
    tpu.vector_store %arg6[%c0_78, %c0_79], %297 {strides = array<i32>} : memref<2x128xf32, #tpu.memory_space<vmem>>, vector<2x128xf32>,
    return
  }
  func.func @transform_0(%arg0: i32) -> (i32, i32, i32) {
    %c0_i32 = arith.constant 0 : i32
    %c0_i32_0 = arith.constant 0 : i32
    %c0_i32_1 = arith.constant 0 : i32
    return %arg0, %c0_i32, %c0_i32_0 : i32, i32, i32
  }
  func.func @transform_1(%arg0: i32) -> (i32, i32) {
    %c0_i32 = arith.constant 0 : i32
    %c0_i32_0 = arith.constant 0 : i32
    %c0_i32_1 = arith.constant 0 : i32
    return %c0_i32, %c0_i32_0 : i32, i32
  }
  func.func @transform_2(%arg0: i32) -> (i32, i32) {
    %c0_i32 = arith.constant 0 : i32
    %c0_i32_0 = arith.constant 0 : i32
    %c0_i32_1 = arith.constant 0 : i32
    return %c0_i32, %c0_i32_0 : i32, i32
  }
  func.func @transform_3(%arg0: i32) -> (i32, i32) {
    %c0_i32 = arith.constant 0 : i32
    %c0_i32_0 = arith.constant 0 : i32
    %c0_i32_1 = arith.constant 0 : i32
    return %c0_i32, %c0_i32_0 : i32, i32
  }
  func.func @transform_4(%arg0: i32) -> (i32, i32, i32) {
    %c0_i32 = arith.constant 0 : i32
    %c0_i32_0 = arith.constant 0 : i32
    %c0_i32_1 = arith.constant 0 : i32
    return %arg0, %c0_i32, %c0_i32_0 : i32, i32, i32
  }
}

</mosaic_0001>

<bundles_post_ra>
// kernel: gru_forward.1
= control target key start
LH: loop header
LB: loop body
LE: loop exit
PB: predicated region body
PF: predicated region fallthrough
CT: control target
= control target key end

     0   :  { %v1475_v3 = vmov 0.0   ;;  %vm32_vm0 = vcmask 1041408   ;;  %vm34_vm1 = vcmask 1043456   ;;  %s2497_s1 = inlined_call_operand.vmem [shape: f32[128,384], index: 1, kind: input, shape index: {}]   ;;  %s2498_s3 = inlined_call_operand.vmem [shape: f32[1,128], index: 3, kind: input, shape index: {}]   ;;  %s2499_s2 = inlined_call_operand.vmem [shape: f32[1,384], index: 2, kind: input, shape index: {}]   ;;  %s2500_s0 = inlined_call_operand.vmem [shape: f32[8,2,384], index: 0, kind: input, shape index: {}]   ;;  %s2501_s4 = inlined_call_operand.vmem [shape: f32[8,2,128], index: 4, kind: output, shape index: {}]  }
   0x1   :  { %v1504_v0 = vld [vmem:[%s2497_s1 + $0x168] sm:$0xff]  ;;  %v1509_v1 = vld [vmem:[%s2497_s1 + $0x170] sm:$0xff]  ;;  %21 = vst [vmem:[#allocation2] sm:$0x3] %v1475_v3  ;;  %v1521_v4 = vld [vmem:[%s2497_s1 + $0x158] sm:$0xff] }
   0x2   :  { %v1514_v2 = vld [vmem:[%s2497_s1 + $0x150] sm:$0xff]  ;;  %86 = vmatpush.msra.mxu0 %v1504_v0  ;;  %106 = vmatpush.msra.mxu1 %v1509_v1  ;;  %v1526_v5 = vld [vmem:[%s2497_s1 + $0x138] sm:$0xff]  ;;  %v1531_v6 = vld [vmem:[%s2497_s1 + $0x140] sm:$0xff] }
   0x3   :  { %253 = vmatpush.msra.mxu3 %v1504_v0  ;;  %v1539_v7 = vld [vmem:[%s2497_s1 + $0x120] sm:$0xff]  ;;  %v1544_v8 = vld [vmem:[%s2497_s1 + $0x128] sm:$0xff]  ;;  %v1557_v10 = vld [vmem:[%s2497_s1 + $0x110] sm:$0xff] }
   0x4   :  { %87 = vmatpush.msra.mxu0 %v1514_v2  ;;  %107 = vmatpush.msra.mxu1 %v1521_v4  ;;  %v1552_v9 = vld [vmem:[%s2497_s1 + $0x108] sm:$0xff]  ;;  %v1565_v11 = vld [vmem:[%s2497_s1 + $0xf0] sm:$0xff]  ;;  %v1570_v12 = vld [vmem:[%s2497_s1 + $0xf8] sm:$0xff] }
   0x5   :  { %254 = vmatpush.msra.mxu3 %v1514_v2  ;;  %v1575_v13 = vld [vmem:[%s2497_s1 + $0x178] sm:$0xff]  ;;  %v1583_v14 = vld [vmem:[%s2497_s1 + $0x160] sm:$0xff]  ;;  %v1602_v17 = vld [vmem:[%s2497_s1 + $0x148] sm:$0xff] }
   0x6   :  { %88 = vmatpush.msra.mxu0 %v1526_v5  ;;  %108 = vmatpush.msra.mxu1 %v1531_v6  ;;  %v1588_v15 = vld [vmem:[%s2497_s1 + $0xd8] sm:$0xff]  ;;  %v1593_v16 = vld [vmem:[%s2497_s1 + $0xe0] sm:$0xff]  ;;  %v1612_v19 = vld [vmem:[%s2497_s1 + $0xc8] sm:$0xff] }
   0x7   :  { %255 = vmatpush.msra.mxu3 %v1526_v5  ;;  %126 = vmatpush.msra.mxu2 %v1575_v13  ;;  %v1607_v18 = vld [vmem:[%s2497_s1 + $0xc0] sm:$0xff]  ;;  %v1621_v20 = vld [vmem:[%s2497_s1 + $0x130] sm:$0xff]  ;;  %v1626_v21 = vld [vmem:[%s2497_s1 + $0xa8] sm:$0xff] }
   0x8   :  { %89 = vmatpush.msra.mxu0 %v1539_v7  ;;  %109 = vmatpush.msra.mxu1 %v1544_v8  ;;  %v1631_v22 = vld [vmem:[%s2497_s1 + $0xb0] sm:$0xff]  ;;  %v1640_v23 = vld [vmem:[%s2497_s1 + $0x118] sm:$0xff]  ;;  %v1659_v26 = vld [vmem:[%s2497_s1 + $0x100] sm:$0xff] }
   0x9   :  { %256 = vmatpush.msra.mxu3 %v1539_v7  ;;  %127 = vmatpush.msra.mxu2 %v1583_v14  ;;  %v1645_v24 = vld [vmem:[%s2497_s1 + $0x90] sm:$0xff]  ;;  %v1650_v25 = vld [vmem:[%s2497_s1 + $0x98] sm:$0xff]  ;;  %v1669_v28 = vld [vmem:[%s2497_s1 + $0x80] sm:$0xff] }
   0xa   :  { %90 = vmatpush.msra.mxu0 %v1552_v9  ;;  %110 = vmatpush.msra.mxu1 %v1557_v10  ;;  %v1664_v27 = vld [vmem:[%s2497_s1 + $0x78] sm:$0xff]  ;;  %v1678_v29 = vld [vmem:[%s2497_s1 + $0xe8] sm:$0xff]  ;;  %v1683_v30 = vld [vmem:[%s2497_s1 + $0x60] sm:$0xff] }
   0xb   :  { %257 = vmatpush.msra.mxu3 %v1552_v9  ;;  %128 = vmatpush.msra.mxu2 %v1602_v17  ;;  %v1688_v31 = vld [vmem:[%s2497_s1 + $0x68] sm:$0xff]  ;;  %v1697_v32 = vld [vmem:[%s2497_s1 + $0xd0] sm:$0xff]  ;;  %v1716_v35 = vld [vmem:[%s2497_s1 + $0xb8] sm:$0xff] }
   0xc   :  { %91 = vmatpush.msra.mxu0 %v1565_v11  ;;  %111 = vmatpush.msra.mxu1 %v1570_v12  ;;  %v1702_v33 = vld [vmem:[%s2497_s1 + $0x48] sm:$0xff]  ;;  %v1707_v34 = vld [vmem:[%s2497_s1 + $0x50] sm:$0xff]  ;;  %v1726_v37 = vld [vmem:[%s2497_s1 + $0x38] sm:$0xff] }
   0xd   :  { %258 = vmatpush.msra.mxu3 %v1565_v11  ;;  %129 = vmatpush.msra.mxu2 %v1621_v20  ;;  %v1721_v36 = vld [vmem:[%s2497_s1 + $0x30] sm:$0xff]  ;;  %v1735_v38 = vld [vmem:[%s2497_s1 + $0xa0] sm:$0xff]  ;;  %v1740_v39 = vld [vmem:[%s2497_s1 + $0x18] sm:$0xff] }
   0xe   :  { %92 = vmatpush.msra.mxu0 %v1588_v15  ;;  %112 = vmatpush.msra.mxu1 %v1593_v16  ;;  %v1745_v40 = vld [vmem:[%s2497_s1 + $0x20] sm:$0xff]  ;;  %v1754_v41 = vld [vmem:[%s2497_s1 + $0x88] sm:$0xff]  ;;  %v1776_v45 = vld [vmem:[%s2497_s1 + $0x70] sm:$0xff] }
   0xf   :  { %259 = vmatpush.msra.mxu3 %v1588_v15  ;;  %130 = vmatpush.msra.mxu2 %v1640_v23  ;;  %v1759_v42 = vld [vmem:[%s2497_s1] sm:$0xff]  ;;  %v1764_v43 = vld [vmem:[%s2497_s1 + $0x8] sm:$0xff]  ;;  %v1786_v46 = vld [vmem:[%s2497_s1 + $0x58] sm:$0xff] }
  0x10   :  { %93 = vmatpush.msra.mxu0 %v1607_v18  ;;  %113 = vmatpush.msra.mxu1 %v1612_v19  ;;  %v1770_v44 = vld [vmem:[#allocation2] sm:$0x3]  ;;  %v1802_v48 = vld [vmem:[%s2497_s1 + $0x28] sm:$0xff]  ;;  %v1811_v49 = vld [vmem:[%s2497_s1 + $0x10] sm:$0xff] }
  0x11   :  { %260 = vmatpush.msra.mxu3 %v1607_v18  ;;  %131 = vmatpush.msra.mxu2 %v1659_v26  ;;  %v1793_v47 = vld [vmem:[%s2497_s1 + $0x40] sm:$0xff] }
  0x12   :  { %94 = vmatpush.msra.mxu0 %v1626_v21  ;;  %114 = vmatpush.msra.mxu1 %v1631_v22  ;;  %v22_v50 = vld [vmem:[%s2499_s2] sm:$0x7] }
  0x13   :  { %261 = vmatpush.msra.mxu3 %v1626_v21  ;;  %132 = vmatpush.msra.mxu2 %v1678_v29  ;;  %v28_v51 = vperm.slane %v22_v50, 1  ;;  %v29_v52 = vperm.slane %v22_v50, 2  ;;  %v27_v53 = vperm.slane %v22_v50, 0  ;;  %v25_v57 = vld [vmem:[%s2500_s0] sm:$0x3f] }
  0x14   :  { %95 = vmatpush.msra.mxu0 %v1645_v24  ;;  %115 = vmatpush.msra.mxu1 %v1650_v25 }
  0x15   :  { %262 = vmatpush.msra.mxu3 %v1645_v24  ;;  %133 = vmatpush.msra.mxu2 %v1697_v32  ;;  %v30_v54 = vrot.slane %v28_v51, 6  ;;  %v31_v55 = vrot.slane %v29_v52, 4 }
  0x16   :  { %96 = vmatpush.msra.mxu0 %v1664_v27  ;;  %116 = vmatpush.msra.mxu1 %v1669_v28 }
  0x17   :  { %263 = vmatpush.msra.mxu3 %v1664_v27  ;;  %134 = vmatpush.msra.mxu2 %v1716_v35  ;;  %v33_v56 = vsel %vm32_vm0, %v27_v53, %v30_v54 }
  0x18   :  { %97 = vmatpush.msra.mxu0 %v1683_v30  ;;  %117 = vmatpush.msra.mxu1 %v1688_v31  ;;  %v1928_v58 = vsel %vm34_vm1, %v33_v56, %v31_v55 }
  0x19   :  { %264 = vmatpush.msra.mxu3 %v1683_v30  ;;  %135 = vmatpush.msra.mxu2 %v1735_v38  ;;  %2507 = vst [vmem:[#allocation3_spill] sm:$0xff] %v1928_v58  ;;  %v37_v59 = vadd.f32 %v1928_v58, %v25_v57 }
  0x1a   :  { %98 = vmatpush.msra.mxu0 %v1702_v33  ;;  %118 = vmatpush.msra.mxu1 %v1707_v34 }
  0x1b   :  { %265 = vmatpush.msra.mxu3 %v1702_v33  ;;  %136 = vmatpush.msra.mxu2 %v1754_v41  ;;  %v167_v60 = vrot.slane %v37_v59, 2 }
  0x1c   :  { %99 = vmatpush.msra.mxu0 %v1721_v36  ;;  %119 = vmatpush.msra.mxu1 %v1726_v37 }
  0x1d   :  { %266 = vmatpush.msra.mxu3 %v1721_v36  ;;  %137 = vmatpush.msra.mxu2 %v1776_v45 }
  0x1e   :  { %100 = vmatpush.msra.mxu0 %v1740_v39  ;;  %120 = vmatpush.msra.mxu1 %v1745_v40 }
  0x1f   :  { %267 = vmatpush.msra.mxu3 %v1740_v39  ;;  %138 = vmatpush.msra.mxu2 %v1786_v46 }
  0x20   :  { %101 = vmatpush.msra.mxu0 %v1759_v42  ;;  %121 = vmatpush.msra.mxu1 %v1764_v43 }
  0x21   :  { %102 = vmatmul.f32.vlgmr.msra.gmra.mxu0 %v1770_v44  ;;  %122 = vmatmul.f32.vlgmr.msra.gmra.mxu1 %v1770_v44 }
  0x22   :  { %273 = vmatpush.msrb.mxu0 %v1509_v1  ;;  %293 = vmatpush.msrb.mxu1 %v1575_v13 }
  0x23   :  { %268 = vmatpush.msra.mxu3 %v1759_v42  ;;  %139 = vmatpush.msra.mxu2 %v1793_v47 }
  0x24   :  { %274 = vmatpush.msrb.mxu0 %v1521_v4  ;;  %294 = vmatpush.msrb.mxu1 %v1583_v14 }
  0x25   :  { %438 = vmatpush.msrb.mxu3 %v1509_v1  ;;  %140 = vmatpush.msra.mxu2 %v1802_v48 }
  0x26   :  { %275 = vmatpush.msrb.mxu0 %v1531_v6  ;;  %295 = vmatpush.msrb.mxu1 %v1602_v17 }
  0x27   :  { %439 = vmatpush.msrb.mxu3 %v1521_v4  ;;  %141 = vmatpush.msra.mxu2 %v1811_v49 }
  0x28   :  { %276 = vmatpush.msrb.mxu0 %v1544_v8  ;;  %296 = vmatpush.msrb.mxu1 %v1621_v20 }
  0x29   :  { %440 = vmatpush.msrb.mxu3 %v1531_v6  ;;  %142 = vmatmul.f32.vlgmr.msra.gmra.mxu2 %v1770_v44 }
  0x2a   :  { %277 = vmatpush.msrb.mxu0 %v1557_v10  ;;  %297 = vmatpush.msrb.mxu1 %v1640_v23 }
  0x2b   :  { %418 = vmatpush.msrb.mxu2 %v1504_v0  ;;  %441 = vmatpush.msrb.mxu3 %v1544_v8 }
  0x2c   :  { %278 = vmatpush.msrb.mxu0 %v1570_v12  ;;  %298 = vmatpush.msrb.mxu1 %v1659_v26 }
  0x2d   :  { %419 = vmatpush.msrb.mxu2 %v1514_v2  ;;  %442 = vmatpush.msrb.mxu3 %v1557_v10 }
  0x2e   :  { %279 = vmatpush.msrb.mxu0 %v1593_v16  ;;  %299 = vmatpush.msrb.mxu1 %v1678_v29 }
  0x2f   :  { %420 = vmatpush.msrb.mxu2 %v1526_v5  ;;  %443 = vmatpush.msrb.mxu3 %v1570_v12 }
  0x30   :  { %280 = vmatpush.msrb.mxu0 %v1612_v19  ;;  %300 = vmatpush.msrb.mxu1 %v1697_v32 }
  0x31   :  { %421 = vmatpush.msrb.mxu2 %v1539_v7  ;;  %444 = vmatpush.msrb.mxu3 %v1593_v16 }
  0x32   :  { %281 = vmatpush.msrb.mxu0 %v1631_v22  ;;  %301 = vmatpush.msrb.mxu1 %v1716_v35 }
  0x33   :  { %422 = vmatpush.msrb.mxu2 %v1552_v9  ;;  %445 = vmatpush.msrb.mxu3 %v1612_v19 }
  0x34   :  { %282 = vmatpush.msrb.mxu0 %v1650_v25  ;;  %302 = vmatpush.msrb.mxu1 %v1735_v38 }
  0x35   :  { %423 = vmatpush.msrb.mxu2 %v1565_v11  ;;  %446 = vmatpush.msrb.mxu3 %v1631_v22 }
  0x36   :  { %283 = vmatpush.msrb.mxu0 %v1669_v28  ;;  %303 = vmatpush.msrb.mxu1 %v1754_v41 }
  0x37   :  { %424 = vmatpush.msrb.mxu2 %v1588_v15  ;;  %447 = vmatpush.msrb.mxu3 %v1650_v25 }
  0x38   :  { %284 = vmatpush.msrb.mxu0 %v1688_v31  ;;  %304 = vmatpush.msrb.mxu1 %v1776_v45 }
  0x39   :  { %425 = vmatpush.msrb.mxu2 %v1607_v18  ;;  %448 = vmatpush.msrb.mxu3 %v1669_v28 }
  0x3a   :  { %285 = vmatpush.msrb.mxu0 %v1707_v34  ;;  %305 = vmatpush.msrb.mxu1 %v1786_v46 }
  0x3b   :  { %426 = vmatpush.msrb.mxu2 %v1626_v21  ;;  %449 = vmatpush.msrb.mxu3 %v1688_v31 }
  0x3c   :  { %286 = vmatpush.msrb.mxu0 %v1726_v37  ;;  %306 = vmatpush.msrb.mxu1 %v1793_v47 }
  0x3d   :  { %427 = vmatpush.msrb.mxu2 %v1645_v24  ;;  %450 = vmatpush.msrb.mxu3 %v1707_v34 }
  0x3e   :  { %287 = vmatpush.msrb.mxu0 %v1745_v40  ;;  %307 = vmatpush.msrb.mxu1 %v1802_v48 }
  0x3f   :  { %428 = vmatpush.msrb.mxu2 %v1664_v27  ;;  %451 = vmatpush.msrb.mxu3 %v1726_v37 }
  0x40   :  { %288 = vmatpush.msrb.mxu0 %v1764_v43  ;;  %308 = vmatpush.msrb.mxu1 %v1811_v49 }
  0x41   :  { %429 = vmatpush.msrb.mxu2 %v1683_v30  ;;  %452 = vmatpush.msrb.mxu3 %v1745_v40 }
  0x42   :  { %458 = vmatpush.msra.mxu0 %v1575_v13  ;;  %583 = vmatpush.msra.mxu1 %v1504_v0 }
  0x43   :  { %430 = vmatpush.msrb.mxu2 %v1702_v33  ;;  %453 = vmatpush.msrb.mxu3 %v1764_v43 }
  0x44   :  { %459 = vmatpush.msra.mxu0 %v1583_v14  ;;  %584 = vmatpush.msra.mxu1 %v1514_v2 }
  0x45   :  { %431 = vmatpush.msrb.mxu2 %v1721_v36 }
  0x46   :  { %460 = vmatpush.msra.mxu0 %v1602_v17  ;;  %585 = vmatpush.msra.mxu1 %v1526_v5 }
  0x47   :  { %432 = vmatpush.msrb.mxu2 %v1740_v39 }
  0x48   :  { %461 = vmatpush.msra.mxu0 %v1621_v20  ;;  %586 = vmatpush.msra.mxu1 %v1539_v7 }
  0x49   :  { %433 = vmatpush.msrb.mxu2 %v1759_v42 }
  0x4a   :  { %462 = vmatpush.msra.mxu0 %v1640_v23  ;;  %587 = vmatpush.msra.mxu1 %v1552_v9 }
  0x4b   :  { %603 = vmatpush.msra.mxu2 %v1509_v1 }
  0x4c   :  { %463 = vmatpush.msra.mxu0 %v1659_v26  ;;  %588 = vmatpush.msra.mxu1 %v1565_v11  ;;  %v1934_v11 = vld [vmem:[%s2498_s3] ss:$0 sm:$0xff] }
  0x4d   :  { %604 = vmatpush.msra.mxu2 %v1521_v4 }
  0x4e   :  { %464 = vmatpush.msra.mxu0 %v1678_v29  ;;  %589 = vmatpush.msra.mxu1 %v1588_v15 }
  0x4f   :  { %605 = vmatpush.msra.mxu2 %v1531_v6 }
  0x50   :  { %465 = vmatpush.msra.mxu0 %v1697_v32  ;;  %590 = vmatpush.msra.mxu1 %v1607_v18 }
  0x51   :  { %606 = vmatpush.msra.mxu2 %v1544_v8 }
  0x52   :  { %466 = vmatpush.msra.mxu0 %v1716_v35  ;;  %591 = vmatpush.msra.mxu1 %v1626_v21 }
  0x53   :  { %607 = vmatpush.msra.mxu2 %v1557_v10 }
  0x54   :  { %467 = vmatpush.msra.mxu0 %v1735_v38  ;;  %592 = vmatpush.msra.mxu1 %v1645_v24 }
  0x55   :  { %608 = vmatpush.msra.mxu2 %v1570_v12 }
  0x56   :  { %468 = vmatpush.msra.mxu0 %v1754_v41  ;;  %593 = vmatpush.msra.mxu1 %v1664_v27 }
  0x57   :  { %609 = vmatpush.msra.mxu2 %v1593_v16 }
  0x58   :  { %469 = vmatpush.msra.mxu0 %v1776_v45  ;;  %594 = vmatpush.msra.mxu1 %v1683_v30 }
  0x59   :  { %610 = vmatpush.msra.mxu2 %v1612_v19 }
  0x5a   :  { %470 = vmatpush.msra.mxu0 %v1786_v46  ;;  %595 = vmatpush.msra.mxu1 %v1702_v33 }
  0x5b   :  { %611 = vmatpush.msra.mxu2 %v1631_v22 }
  0x5c   :  { %471 = vmatpush.msra.mxu0 %v1793_v47  ;;  %596 = vmatpush.msra.mxu1 %v1721_v36 }
  0x5d   :  { %612 = vmatpush.msra.mxu2 %v1650_v25 }
  0x5e   :  { %472 = vmatpush.msra.mxu0 %v1802_v48  ;;  %597 = vmatpush.msra.mxu1 %v1740_v39 }
  0x5f   :  { %613 = vmatpush.msra.mxu2 %v1669_v28  ;;  %v194_v28 = vrot.slane %v37_v59, 4 }
  0x60   :  { %473 = vmatpush.msra.mxu0 %v1811_v49  ;;  %598 = vmatpush.msra.mxu1 %v1759_v42 }
  0x61   :  { %614 = vmatpush.msra.mxu2 %v1688_v31 }
  0x63   :  { %615 = vmatpush.msra.mxu2 %v1707_v34 }
  0x65   :  { %616 = vmatpush.msra.mxu2 %v1726_v37 }
  0x67   :  { %617 = vmatpush.msra.mxu2 %v1745_v40 }
  0x69   :  { %618 = vmatpush.msra.mxu2 %v1764_v43 }
  0x9e   :  { %v103_v61 = vpop.f32.mrf.mxu0  ;;  %v123_v62 = vpop.f32.mrf.mxu1 }
  0x9f   :  { %v146_v63 = vadd.f32 %v103_v61, %v37_v59  ;;  %v169_v0 = vadd.f32 %v167_v60, %v123_v62 }
  0xa1   :  { %v1362_v1 = vmul.f32 -1.442695, %v146_v63  ;;  %v1363_v2 = vmul.f32 -1.442695, %v169_v0 }
  0xa3   :  { %1394 = vpow2.f32 %v1362_v1 }
  0xa4   :  { %1396 = vpow2.f32 %v1363_v2 }
  0xa9   :  { %v1395_v3 = vpop.eup %1394 }
  0xaa   :  { %v1397_v4 = vpop.eup %1396  ;;  %v150_v5 = vadd.f32 1.0, %v1395_v3 }
  0xab   :  { %v173_v6 = vadd.f32 1.0, %v1397_v4 }
  0xac   :  { %1398 = vrcp.f32 %v150_v5  ;;  %v143_v15 = vpop.f32.mrf.mxu2  ;;  %v162_v16 = vand.u32 2147483648, %v150_v5  ;;  %v160_v19 = vand.u32 2147483647, %v150_v5  ;;  %vm156_vm3 = vweird.f32 %v150_v5 }
  0xad   :  { %1400 = vrcp.f32 %v173_v6  ;;  %v192_v22 = vadd.f32 %v1934_v11, %v143_v15  ;;  %vm179_vm6 = vweird.f32 %v173_v6  ;;  %v185_v36 = vand.u32 2147483648, %v173_v6 }
  0xae   :  { %v163_v25 = vor.u32 1.1754944e-38, %v162_v16  ;;  %vm161_vm5 = vcmp.eq.f32.partialorder %v160_v19, 8.507059e+37  ;;  %v183_v39 = vand.u32 2147483647, %v173_v6 }
  0xaf   :  { %v186_v40 = vor.u32 1.1754944e-38, %v185_v36 }
  0xb0   :  { %vm184_vm9 = vcmp.eq.f32.partialorder %v183_v39, 8.507059e+37 }
  0xb2   :  { %v1399_v7 = vpop.eup %1398 }
  0xb3   :  { %v1401_v8 = vpop.eup %1400  ;;  %v152_v9 = vmul.f32 %v1399_v7, %v150_v5  ;;  %vm157_vm2 = vweird.f32 %v1399_v7 }
  0xb4   :  { %v175_v12 = vmul.f32 %v1401_v8, %v173_v6  ;;  %vm158_vm4 = vmor %vm156_vm3, %vm157_vm2  ;;  %vm180_vm7 = vweird.f32 %v1401_v8 }
  0xb5   :  { %v153_v10 = vsub.f32 1.0, %v152_v9  ;;  %vm181_vm8 = vmor %vm179_vm6, %vm180_vm7 }
  0xb6   :  { %v176_v24 = vsub.f32 1.0, %v175_v12 }
  0xb7   :  { %v154_v18 = vmul.f32 %v1399_v7, %v153_v10 }
  0xb8   :  { %v177_v33 = vmul.f32 %v1401_v8, %v176_v24 }
  0xb9   :  { %v155_v21 = vadd.f32 %v1399_v7, %v154_v18 }
  0xba   :  { %v178_v37 = vadd.f32 %v1401_v8, %v177_v33 }
  0xbb   :  { %v159_v27 = vsel %vm158_vm4, %v1399_v7, %v155_v21  ;;  %v1368_v21 = vld [vmem:[%s2500_s0 + $0xc] sm:$0x3f] }
  0xbc   :  { %v164_v30 = vsel %vm161_vm5, %v163_v25, %v159_v27  ;;  %v182_v42 = vsel %vm181_vm8, %v1401_v8, %v178_v37 }
  0xbd   :  { %v193_v31 = vmul.f32 %v192_v22, %v164_v30  ;;  %v187_v51 = vsel %vm184_vm9, %v186_v40, %v182_v42  ;;  %v369_v22 = vadd.f32 %v1368_v21, %v1928_v58  ;;  %v2108_v21 = vld [vmem:[%s2497_s1 + $0xd8] sm:$0xff] }
  0xbf   :  { %v196_v34 = vadd.f32 %v194_v28, %v193_v31  ;;  %v499_v24 = vrot.slane %v369_v22, 2 }
  0xc1   :  { %1402 = vtanh.f32 %v196_v34 }
  0xc7   :  { %v1403_v43 = vpop.eup %1402 }
  0xc8   :  { %v198_v50 = vsub.f32 %v1770_v44, %v1403_v43 }
  0xca   :  { %v199_v52 = vmul.f32 %v198_v50, %v187_v51 }
  0xcc   :  { %v1938_v53 = vadd.f32 %v1403_v43, %v199_v52 }
  0xce   :  { %201 = vst [vmem:[%s2501_s4] sm:$0x3] %v1938_v53  ;;  %269 = vmatmul.f32.vlgmr.msra.gmra.mxu3 %v1938_v53  ;;  %289 = vmatmul.f32.vlgmr.msrb.gmra.mxu0 %v1938_v53 }
  0xcf   :  { %309 = vmatmul.f32.vlgmr.msrb.gmra.mxu1 %v1938_v53  ;;  %623 = vmatpush.msra.mxu3 %v1575_v13  ;;  %v1364_v13 = vld [vmem:[%s2500_s0 + $0x6] sm:$0x3f] }
  0xd1   :  { %624 = vmatpush.msra.mxu3 %v1583_v14  ;;  %v204_v14 = vadd.f32 %v1364_v13, %v1928_v58 }
  0xd3   :  { %625 = vmatpush.msra.mxu3 %v1602_v17  ;;  %v334_v17 = vrot.slane %v204_v14, 2  ;;  %v358_v63 = vrot.slane %v204_v14, 4 }
  0xd5   :  { %626 = vmatpush.msra.mxu3 %v1621_v20 }
  0xd7   :  { %627 = vmatpush.msra.mxu3 %v1640_v23 }
  0xd9   :  { %628 = vmatpush.msra.mxu3 %v1659_v26 }
  0xdb   :  { %629 = vmatpush.msra.mxu3 %v1678_v29 }
  0xdd   :  { %630 = vmatpush.msra.mxu3 %v1697_v32 }
  0xdf   :  { %631 = vmatpush.msra.mxu3 %v1716_v35 }
  0xe1   :  { %632 = vmatpush.msra.mxu3 %v1735_v38 }
  0xe3   :  { %633 = vmatpush.msra.mxu3 %v1754_v41 }
  0xe5   :  { %634 = vmatpush.msra.mxu3 %v1776_v45 }
  0xe7   :  { %635 = vmatpush.msra.mxu3 %v1786_v46 }
  0xe9   :  { %636 = vmatpush.msra.mxu3 %v1793_v47 }
  0xeb   :  { %637 = vmatpush.msra.mxu3 %v1802_v48 }
  0xed   :  { %638 = vmatpush.msra.mxu3 %v1811_v49 }
 0x14b   :  { %v290_v20 = vpop.f32.mrf.mxu0 }
 0x14c   :  { %v336_v23 = vadd.f32 %v334_v17, %v290_v20  ;;  %v310_v59 = vpop.f32.mrf.mxu1 }
 0x14d   :  { %v356_v0 = vadd.f32 %v1934_v11, %v310_v59 }
 0x14e   :  { %v1366_v26 = vmul.f32 -1.442695, %v336_v23 }
 0x150   :  { %1404 = vpow2.f32 %v1366_v26 }
 0x151   :  { %v270_v29 = vpop.f32.mrf.mxu3 }
 0x152   :  { %v313_v32 = vadd.f32 %v270_v29, %v204_v14 }
 0x154   :  { %v1365_v35 = vmul.f32 -1.442695, %v313_v32  ;;  %v523_v32 = vrot.slane %v369_v22, 4 }
 0x156   :  { %1406 = vpow2.f32 %v1365_v35  ;;  %v1405_v38 = vpop.eup %1404 }
 0x157   :  { %v340_v44 = vadd.f32 1.0, %v1405_v38 }
 0x159   :  { %v352_v7 = vand.u32 2147483648, %v340_v44  ;;  %vm346_vm15 = vweird.f32 %v340_v44  ;;  %v350_v8 = vand.u32 2147483647, %v340_v44 }
 0x15b   :  { %v353_v12 = vor.u32 1.1754944e-38, %v352_v7  ;;  %vm351_vm1 = vcmp.eq.f32.partialorder %v350_v8, 8.507059e+37  ;;  %v2055_v7 = vld [vmem:[%s2497_s1 + $0x130] sm:$0xff]  ;;  %v2064_v8 = vld [vmem:[%s2497_s1 + $0x108] sm:$0xff] }
 0x15c   :  { %v1407_v41 = vpop.eup %1406 }
 0x15d   :  { %v317_v45 = vadd.f32 1.0, %v1407_v41 }
 0x15f   :  { %1408 = vrcp.f32 %v317_v45  ;;  %v329_v55 = vand.u32 2147483648, %v317_v45  ;;  %v327_v57 = vand.u32 2147483647, %v317_v45  ;;  %vm323_vm11 = vweird.f32 %v317_v45 }
 0x160   :  { %1410 = vrcp.f32 %v340_v44 }
 0x161   :  { %v330_v62 = vor.u32 1.1754944e-38, %v329_v55  ;;  %vm328_vm13 = vcmp.eq.f32.partialorder %v327_v57, 8.507059e+37 }
 0x165   :  { %v1409_v46 = vpop.eup %1408 }
 0x166   :  { %v1411_v47 = vpop.eup %1410  ;;  %v319_v48 = vmul.f32 %v1409_v46, %v317_v45  ;;  %vm324_vm10 = vweird.f32 %v1409_v46 }
 0x167   :  { %v342_v54 = vmul.f32 %v1411_v47, %v340_v44  ;;  %vm325_vm12 = vmor %vm323_vm11, %vm324_vm10  ;;  %vm347_vm14 = vweird.f32 %v1411_v47 }
 0x168   :  { %v320_v49 = vsub.f32 1.0, %v319_v48  ;;  %vm348_vm0 = vmor %vm346_vm15, %vm347_vm14 }
 0x169   :  { %v343_v61 = vsub.f32 1.0, %v342_v54 }
 0x16a   :  { %v321_v56 = vmul.f32 %v1409_v46, %v320_v49 }
 0x16b   :  { %v344_v4 = vmul.f32 %v1411_v47, %v343_v61  ;;  %v1994_v61 = vld [vmem:[%s2497_s1 + $0x170] sm:$0xff] }
 0x16c   :  { %v322_v60 = vadd.f32 %v1409_v46, %v321_v56  ;;  %768 = vmatpush.msrb.mxu1 %v1994_v61 }
 0x16d   :  { %v345_v6 = vadd.f32 %v1411_v47, %v344_v4  ;;  %v2036_v4 = vld [vmem:[%s2497_s1 + $0x148] sm:$0xff] }
 0x16e   :  { %v326_v1 = vsel %vm325_vm12, %v1409_v46, %v322_v60  ;;  %v1989_v60 = vld [vmem:[%s2497_s1 + $0x168] sm:$0xff] }
 0x16f   :  { %v331_v2 = vsel %vm328_vm13, %v330_v62, %v326_v1  ;;  %v349_v9 = vsel %vm348_vm0, %v1411_v47, %v345_v6  ;;  %v1999_v62 = vld [vmem:[%s2497_s1 + $0x178] sm:$0xff]  ;;  %748 = vmatpush.msrb.mxu0 %v1989_v60  ;;  %v2017_v1 = vld [vmem:[%s2497_s1 + $0x160] sm:$0xff]  ;;  %v2050_v6 = vld [vmem:[%s2497_s1 + $0x128] sm:$0xff] }
 0x170   :  { %v357_v3 = vmul.f32 %v356_v0, %v331_v2  ;;  %v354_v16 = vsel %vm351_vm1, %v353_v12, %v349_v9  ;;  %v2012_v0 = vld [vmem:[%s2497_s1 + $0x158] sm:$0xff]  ;;  %2508 = vst [vmem:[#allocation4_spill] sm:$0xff] %v2050_v6  ;;  %v2069_v9 = vld [vmem:[%s2497_s1 + $0x110] sm:$0xff] }
 0x171   :  { %769 = vmatpush.msrb.mxu1 %v2012_v0  ;;  %v2026_v2 = vld [vmem:[%s2497_s1 + $0x138] sm:$0xff]  ;;  %v1372_v12 = vld [vmem:[%s2500_s0 + $0x12] sm:$0x3f] }
 0x172   :  { %v360_v5 = vadd.f32 %v358_v63, %v357_v3  ;;  %v2007_v63 = vld [vmem:[%s2497_s1 + $0x150] sm:$0xff]  ;;  %v2031_v3 = vld [vmem:[%s2497_s1 + $0x140] sm:$0xff] }
 0x173   :  { %749 = vmatpush.msrb.mxu0 %v2007_v63  ;;  %770 = vmatpush.msrb.mxu1 %v2031_v3 }
 0x174   :  { %1412 = vtanh.f32 %v360_v5  ;;  %v2045_v5 = vld [vmem:[%s2497_s1 + $0x120] sm:$0xff] }
 0x175   :  { %750 = vmatpush.msrb.mxu0 %v2026_v2  ;;  %771 = vmatpush.msrb.mxu1 %v2050_v6 }
 0x177   :  { %751 = vmatpush.msrb.mxu0 %v2045_v5  ;;  %772 = vmatpush.msrb.mxu1 %v2069_v9 }
 0x179   :  { %752 = vmatpush.msrb.mxu0 %v2064_v8 }
 0x17a   :  { %v1413_v10 = vpop.eup %1412 }
 0x17b   :  { %v362_v15 = vsub.f32 %v1938_v53, %v1413_v10 }
 0x17d   :  { %v363_v18 = vmul.f32 %v362_v15, %v354_v16  ;;  %v2086_v15 = vld [vmem:[%s2497_s1 + $0xf0] sm:$0xff]  ;;  %v2091_v16 = vld [vmem:[%s2497_s1 + $0xf8] sm:$0xff] }
 0x17e   :  { %753 = vmatpush.msrb.mxu0 %v2086_v15  ;;  %773 = vmatpush.msrb.mxu1 %v2091_v16 }
 0x17f   :  { %v364_v19 = vadd.f32 %v1413_v10, %v363_v18  ;;  %v2074_v10 = vld [vmem:[%s2497_s1 + $0x118] sm:$0xff]  ;;  %v2096_v18 = vld [vmem:[%s2497_s1 + $0x100] sm:$0xff] }
 0x180   :  { %2509 = vst [vmem:[#allocation5_spill] sm:$0xff] %v2074_v10  ;;  %754 = vmatpush.msrb.mxu0 %v2108_v21 }
 0x181   :  { %1367 = vst [vmem:[%s2501_s4 + $0x2] sm:$0x3] %v364_v19  ;;  %434 = vmatmul.f32.vlgmr.msrb.gmra.mxu2 %v364_v19  ;;  %454 = vmatmul.f32.vlgmr.msrb.gmra.mxu3 %v364_v19 }
 0x182   :  { %474 = vmatmul.f32.vlgmr.msra.gmra.mxu0 %v364_v19  ;;  %788 = vmatpush.msrb.mxu2 %v1999_v62 }
 0x183   :  { %913 = vmatpush.msrb.mxu3 %v1989_v60 }
 0x184   :  { %789 = vmatpush.msrb.mxu2 %v2017_v1 }
 0x185   :  { %914 = vmatpush.msrb.mxu3 %v2007_v63 }
 0x186   :  { %790 = vmatpush.msrb.mxu2 %v2036_v4 }
 0x187   :  { %915 = vmatpush.msrb.mxu3 %v2026_v2 }
 0x188   :  { %791 = vmatpush.msrb.mxu2 %v2055_v7 }
 0x189   :  { %916 = vmatpush.msrb.mxu3 %v2045_v5 }
 0x18a   :  { %792 = vmatpush.msrb.mxu2 %v2074_v10 }
 0x18b   :  { %917 = vmatpush.msrb.mxu3 %v2064_v8 }
 0x18c   :  { %793 = vmatpush.msrb.mxu2 %v2096_v18 }
 0x18d   :  { %918 = vmatpush.msrb.mxu3 %v2086_v15 }
 0x18f   :  { %919 = vmatpush.msrb.mxu3 %v2108_v21 }
 0x1ff   :  { %v475_v14 = vpop.f32.mrf.mxu0 }
 0x200   :  { %v521_v26 = vadd.f32 %v1934_v11, %v475_v14  ;;  %v2205_v14 = vld [vmem:[%s2497_s1 + $0x60] sm:$0xff] }
 0x204   :  { %v435_v25 = vpop.f32.mrf.mxu2  ;;  %v455_v27 = vpop.f32.mrf.mxu3 }
 0x205   :  { %v478_v28 = vadd.f32 %v435_v25, %v369_v22  ;;  %v501_v30 = vadd.f32 %v499_v24, %v455_v27  ;;  %v2113_v22 = vld [vmem:[%s2497_s1 + $0xe0] sm:$0xff]  ;;  %v2118_v24 = vld [vmem:[%s2497_s1 + $0xe8] sm:$0xff] }
 0x206   :  { %774 = vmatpush.msrb.mxu1 %v2113_v22  ;;  %794 = vmatpush.msrb.mxu2 %v2118_v24  ;;  %v2127_v25 = vld [vmem:[%s2497_s1 + $0xc0] sm:$0xff]  ;;  %v2132_v27 = vld [vmem:[%s2497_s1 + $0xc8] sm:$0xff] }
 0x207   :  { %v1369_v31 = vmul.f32 -1.442695, %v478_v28  ;;  %v1370_v33 = vmul.f32 -1.442695, %v501_v30  ;;  %v2137_v28 = vld [vmem:[%s2497_s1 + $0xd0] sm:$0xff]  ;;  %755 = vmatpush.msrb.mxu0 %v2127_v25  ;;  %920 = vmatpush.msrb.mxu3 %v2127_v25 }
 0x208   :  { %775 = vmatpush.msrb.mxu1 %v2132_v27  ;;  %795 = vmatpush.msrb.mxu2 %v2137_v28 }
 0x209   :  { %1414 = vpow2.f32 %v1369_v31 }
 0x20a   :  { %1416 = vpow2.f32 %v1370_v33  ;;  %v2147_v33 = vld [vmem:[%s2497_s1 + $0xa8] sm:$0xff] }
 0x20b   :  { %756 = vmatpush.msrb.mxu0 %v2147_v33  ;;  %921 = vmatpush.msrb.mxu3 %v2147_v33 }
 0x20f   :  { %v1415_v34 = vpop.eup %1414 }
 0x210   :  { %v1417_v36 = vpop.eup %1416  ;;  %v482_v37 = vadd.f32 1.0, %v1415_v34  ;;  %v2152_v34 = vld [vmem:[%s2497_s1 + $0xb0] sm:$0xff] }
 0x211   :  { %v505_v39 = vadd.f32 1.0, %v1417_v36  ;;  %v2157_v36 = vld [vmem:[%s2497_s1 + $0xb8] sm:$0xff]  ;;  %776 = vmatpush.msrb.mxu1 %v2152_v34 }
 0x212   :  { %1418 = vrcp.f32 %v482_v37  ;;  %v494_v51 = vand.u32 2147483648, %v482_v37  ;;  %v492_v13 = vand.u32 2147483647, %v482_v37  ;;  %vm488_vm3 = vweird.f32 %v482_v37  ;;  %796 = vmatpush.msrb.mxu2 %v2157_v36 }
 0x213   :  { %1420 = vrcp.f32 %v505_v39  ;;  %v517_v46 = vand.u32 2147483648, %v505_v39  ;;  %vm511_vm7 = vweird.f32 %v505_v39  ;;  %v515_v47 = vand.u32 2147483647, %v505_v39 }
 0x214   :  { %v495_v20 = vor.u32 1.1754944e-38, %v494_v51  ;;  %vm493_vm5 = vcmp.eq.f32.partialorder %v492_v13, 8.507059e+37  ;;  %v2191_v51 = vld [vmem:[%s2497_s1 + $0x80] sm:$0xff] }
 0x215   :  { %v518_v54 = vor.u32 1.1754944e-38, %v517_v46  ;;  %vm516_vm9 = vcmp.eq.f32.partialorder %v515_v47, 8.507059e+37  ;;  %v2263_v46 = vld [vmem:[%s2497_s1 + $0x20] sm:$0xff] }
 0x218   :  { %v1419_v40 = vpop.eup %1418 }
 0x219   :  { %v1421_v42 = vpop.eup %1420  ;;  %v484_v43 = vmul.f32 %v1419_v40, %v482_v37  ;;  %vm489_vm2 = vweird.f32 %v1419_v40 }
 0x21a   :  { %v507_v52 = vmul.f32 %v1421_v42, %v505_v39  ;;  %vm490_vm4 = vmor %vm488_vm3, %vm489_vm2  ;;  %vm512_vm6 = vweird.f32 %v1421_v42 }
 0x21b   :  { %v485_v50 = vsub.f32 1.0, %v484_v43  ;;  %vm513_vm8 = vmor %vm511_vm7, %vm512_vm6  ;;  %v2177_v43 = vld [vmem:[%s2497_s1 + $0xa0] sm:$0xff] }
 0x21c   :  { %v508_v23 = vsub.f32 1.0, %v507_v52  ;;  %797 = vmatpush.msrb.mxu2 %v2177_v43  ;;  %v2196_v52 = vld [vmem:[%s2497_s1 + $0x88] sm:$0xff] }
 0x21d   :  { %v486_v53 = vmul.f32 %v1419_v40, %v485_v50  ;;  %v2186_v50 = vld [vmem:[%s2497_s1 + $0x78] sm:$0xff] }
 0x21e   :  { %v509_v41 = vmul.f32 %v1421_v42, %v508_v23  ;;  %798 = vmatpush.msrb.mxu2 %v2196_v52 }
 0x21f   :  { %v487_v17 = vadd.f32 %v1419_v40, %v486_v53 }
 0x220   :  { %v510_v45 = vadd.f32 %v1421_v42, %v509_v41  ;;  %v2252_v41 = vld [vmem:[%s2497_s1 + $0x40] sm:$0xff] }
 0x221   :  { %v491_v29 = vsel %vm490_vm4, %v1419_v40, %v487_v17  ;;  %v2167_v40 = vld [vmem:[%s2497_s1 + $0x90] sm:$0xff]  ;;  %v2210_v17 = vld [vmem:[%s2497_s1 + $0x68] sm:$0xff] }
 0x222   :  { %v496_v35 = vsel %vm493_vm5, %v495_v20, %v491_v29  ;;  %v514_v48 = vsel %vm513_vm8, %v1421_v42, %v510_v45  ;;  %v2172_v42 = vld [vmem:[%s2497_s1 + $0x98] sm:$0xff]  ;;  %757 = vmatpush.msrb.mxu0 %v2167_v40  ;;  %922 = vmatpush.msrb.mxu3 %v2167_v40  ;;  %v2215_v20 = vld [vmem:[%s2497_s1 + $0x70] sm:$0xff] }
 0x223   :  { %v522_v38 = vmul.f32 %v521_v26, %v496_v35  ;;  %v519_v56 = vsel %vm516_vm9, %v518_v54, %v514_v48  ;;  %777 = vmatpush.msrb.mxu1 %v2172_v42  ;;  %799 = vmatpush.msrb.mxu2 %v2215_v20  ;;  %v2224_v26 = vld [vmem:[%s2497_s1 + $0x48] sm:$0xff]  ;;  %v2229_v29 = vld [vmem:[%s2497_s1 + $0x50] sm:$0xff]  ;;  %v2258_v45 = vld [vmem:[%s2497_s1 + $0x18] sm:$0xff] }
 0x224   :  { %758 = vmatpush.msrb.mxu0 %v2186_v50  ;;  %923 = vmatpush.msrb.mxu3 %v2186_v50  ;;  %v2242_v35 = vld [vmem:[%s2497_s1 + $0x30] sm:$0xff]  ;;  %v2271_v48 = vld [vmem:[%s2497_s1 + $0x28] sm:$0xff] }
 0x225   :  { %v525_v44 = vadd.f32 %v523_v32, %v522_v38  ;;  %778 = vmatpush.msrb.mxu1 %v2191_v51  ;;  %v2234_v32 = vld [vmem:[%s2497_s1 + $0x58] sm:$0xff]  ;;  %v2282_v54 = vld [vmem:[%s2497_s1 + $0x8] sm:$0xff] }
 0x226   :  { %759 = vmatpush.msrb.mxu0 %v2205_v14  ;;  %924 = vmatpush.msrb.mxu3 %v2205_v14  ;;  %v2247_v38 = vld [vmem:[%s2497_s1 + $0x38] sm:$0xff] }
 0x227   :  { %1422 = vtanh.f32 %v525_v44  ;;  %779 = vmatpush.msrb.mxu1 %v2210_v17  ;;  %800 = vmatpush.msrb.mxu2 %v2234_v32 }
 0x228   :  { %760 = vmatpush.msrb.mxu0 %v2224_v26  ;;  %925 = vmatpush.msrb.mxu3 %v2224_v26 }
 0x229   :  { %780 = vmatpush.msrb.mxu1 %v2229_v29  ;;  %801 = vmatpush.msrb.mxu2 %v2252_v41 }
 0x22a   :  { %761 = vmatpush.msrb.mxu0 %v2242_v35  ;;  %926 = vmatpush.msrb.mxu3 %v2242_v35 }
 0x22b   :  { %781 = vmatpush.msrb.mxu1 %v2247_v38  ;;  %802 = vmatpush.msrb.mxu2 %v2271_v48 }
 0x22c   :  { %762 = vmatpush.msrb.mxu0 %v2258_v45  ;;  %927 = vmatpush.msrb.mxu3 %v2258_v45 }
 0x22d   :  { %v1423_v49 = vpop.eup %1422  ;;  %782 = vmatpush.msrb.mxu1 %v2263_v46 }
 0x22e   :  { %v527_v55 = vsub.f32 %v364_v19, %v1423_v49  ;;  %v2102_v19 = vadd.f32 %v1372_v12, %v1928_v58 }
 0x22f   :  { %783 = vmatpush.msrb.mxu1 %v2282_v54 }
 0x230   :  { %v528_v57 = vmul.f32 %v527_v55, %v519_v56  ;;  %v664_v39 = vrot.slane %v2102_v19, 2  ;;  %v2290_v55 = vld [vmem:[%s2497_s1 + $0x10] sm:$0xff] }
 0x231   :  { %803 = vmatpush.msrb.mxu2 %v2290_v55 }
 0x232   :  { %v1977_v59 = vadd.f32 %v1423_v49, %v528_v57  ;;  %v2277_v49 = vld [vmem:[%s2497_s1] sm:$0xff] }
 0x233   :  { %763 = vmatpush.msrb.mxu0 %v2277_v49  ;;  %928 = vmatpush.msrb.mxu3 %v2277_v49 }
 0x234   :  { %1371 = vst [vmem:[%s2501_s4 + $0x4] sm:$0x3] %v1977_v59  ;;  %599 = vmatmul.f32.vlgmr.msra.gmra.mxu1 %v1977_v59  ;;  %619 = vmatmul.f32.vlgmr.msra.gmra.mxu2 %v1977_v59 }
 0x235   :  { %639 = vmatmul.f32.vlgmr.msra.gmra.mxu3 %v1977_v59  ;;  %933 = vmatpush.msra.mxu0 %v1994_v61 }
 0x236   :  { %953 = vmatpush.msra.mxu1 %v1999_v62  ;;  %1078 = vmatpush.msra.mxu2 %v1989_v60 }
 0x237   :  { %934 = vmatpush.msra.mxu0 %v2012_v0  ;;  %1098 = vmatpush.msra.mxu3 %v1994_v61 }
 0x238   :  { %954 = vmatpush.msra.mxu1 %v2017_v1  ;;  %1079 = vmatpush.msra.mxu2 %v2007_v63 }
 0x239   :  { %935 = vmatpush.msra.mxu0 %v2031_v3  ;;  %1099 = vmatpush.msra.mxu3 %v2012_v0 }
 0x23a   :  { %955 = vmatpush.msra.mxu1 %v2036_v4  ;;  %1080 = vmatpush.msra.mxu2 %v2026_v2 }
 0x23b   :  { %936 = vmatpush.msra.mxu0 %v2050_v6  ;;  %1100 = vmatpush.msra.mxu3 %v2031_v3 }
 0x23c   :  { %956 = vmatpush.msra.mxu1 %v2055_v7  ;;  %1081 = vmatpush.msra.mxu2 %v2045_v5 }
 0x23d   :  { %937 = vmatpush.msra.mxu0 %v2069_v9  ;;  %1101 = vmatpush.msra.mxu3 %v2050_v6 }
 0x23e   :  { %957 = vmatpush.msra.mxu1 %v2074_v10  ;;  %1082 = vmatpush.msra.mxu2 %v2064_v8 }
 0x23f   :  { %938 = vmatpush.msra.mxu0 %v2091_v16  ;;  %1102 = vmatpush.msra.mxu3 %v2069_v9 }
 0x240   :  { %958 = vmatpush.msra.mxu1 %v2096_v18  ;;  %1083 = vmatpush.msra.mxu2 %v2086_v15 }
 0x241   :  { %939 = vmatpush.msra.mxu0 %v2113_v22  ;;  %1103 = vmatpush.msra.mxu3 %v2091_v16 }
 0x242   :  { %959 = vmatpush.msra.mxu1 %v2118_v24  ;;  %1084 = vmatpush.msra.mxu2 %v2108_v21 }
 0x243   :  { %940 = vmatpush.msra.mxu0 %v2132_v27  ;;  %1104 = vmatpush.msra.mxu3 %v2113_v22 }
 0x244   :  { %960 = vmatpush.msra.mxu1 %v2137_v28  ;;  %1085 = vmatpush.msra.mxu2 %v2127_v25 }
 0x245   :  { %941 = vmatpush.msra.mxu0 %v2152_v34  ;;  %1105 = vmatpush.msra.mxu3 %v2132_v27 }
 0x246   :  { %961 = vmatpush.msra.mxu1 %v2157_v36  ;;  %1086 = vmatpush.msra.mxu2 %v2147_v33 }
 0x247   :  { %942 = vmatpush.msra.mxu0 %v2172_v42  ;;  %1106 = vmatpush.msra.mxu3 %v2152_v34 }
 0x248   :  { %962 = vmatpush.msra.mxu1 %v2177_v43  ;;  %1087 = vmatpush.msra.mxu2 %v2167_v40 }
 0x249   :  { %943 = vmatpush.msra.mxu0 %v2191_v51  ;;  %1107 = vmatpush.msra.mxu3 %v2172_v42 }
 0x24a   :  { %963 = vmatpush.msra.mxu1 %v2196_v52  ;;  %1088 = vmatpush.msra.mxu2 %v2186_v50 }
 0x24b   :  { %944 = vmatpush.msra.mxu0 %v2210_v17  ;;  %1108 = vmatpush.msra.mxu3 %v2191_v51 }
 0x24c   :  { %964 = vmatpush.msra.mxu1 %v2215_v20  ;;  %1089 = vmatpush.msra.mxu2 %v2205_v14 }
 0x24d   :  { %945 = vmatpush.msra.mxu0 %v2229_v29  ;;  %1109 = vmatpush.msra.mxu3 %v2210_v17 }
 0x24e   :  { %965 = vmatpush.msra.mxu1 %v2234_v32  ;;  %1090 = vmatpush.msra.mxu2 %v2224_v26 }
 0x24f   :  { %946 = vmatpush.msra.mxu0 %v2247_v38  ;;  %1110 = vmatpush.msra.mxu3 %v2229_v29 }
 0x250   :  { %966 = vmatpush.msra.mxu1 %v2252_v41  ;;  %1091 = vmatpush.msra.mxu2 %v2242_v35 }
 0x251   :  { %947 = vmatpush.msra.mxu0 %v2263_v46  ;;  %1111 = vmatpush.msra.mxu3 %v2247_v38 }
 0x252   :  { %967 = vmatpush.msra.mxu1 %v2271_v48  ;;  %1092 = vmatpush.msra.mxu2 %v2258_v45 }
 0x253   :  { %948 = vmatpush.msra.mxu0 %v2282_v54  ;;  %1112 = vmatpush.msra.mxu3 %v2263_v46 }
 0x254   :  { %968 = vmatpush.msra.mxu1 %v2290_v55  ;;  %1093 = vmatpush.msra.mxu2 %v2277_v49 }
 0x255   :  { %1113 = vmatpush.msra.mxu3 %v2282_v54 }
 0x2b1   :  { %v600_v30 = vpop.f32.mrf.mxu1 }
 0x2b2   :  { %v643_v31 = vadd.f32 %v600_v30, %v2102_v19 }
 0x2b4   :  { %v1373_v37 = vmul.f32 -1.442695, %v643_v31 }
 0x2b6   :  { %1424 = vpow2.f32 %v1373_v37 }
 0x2b7   :  { %v620_v53 = vpop.f32.mrf.mxu2 }
 0x2b8   :  { %v666_v13 = vadd.f32 %v664_v39, %v620_v53 }
 0x2ba   :  { %v1374_v23 = vmul.f32 -1.442695, %v666_v13 }
 0x2bc   :  { %v1425_v44 = vpop.eup %1424  ;;  %1426 = vpow2.f32 %v1374_v23  ;;  %v640_v23 = vpop.f32.mrf.mxu3 }
 0x2bd   :  { %v647_v47 = vadd.f32 1.0, %v1425_v44  ;;  %v686_v6 = vadd.f32 %v1934_v11, %v640_v23 }
 0x2bf   :  { %1428 = vrcp.f32 %v647_v47  ;;  %v659_v37 = vand.u32 2147483648, %v647_v47  ;;  %v657_v53 = vand.u32 2147483647, %v647_v47  ;;  %vm653_vm11 = vweird.f32 %v647_v47 }
 0x2c1   :  { %vm658_vm13 = vcmp.eq.f32.partialorder %v657_v53, 8.507059e+37 }
 0x2c2   :  { %v1427_v56 = vpop.eup %1426 }
 0x2c3   :  { %v2298_v57 = vadd.f32 1.0, %v1427_v56 }
 0x2c5   :  { %v1429_v12 = vpop.eup %1428  ;;  %1430 = vrcp.f32 %v2298_v57  ;;  %vm676_vm15 = vweird.f32 %v2298_v57 }
 0x2c6   :  { %v649_v30 = vmul.f32 %v1429_v12, %v647_v47  ;;  %vm654_vm10 = vweird.f32 %v1429_v12 }
 0x2c7   :  { %vm655_vm12 = vmor %vm653_vm11, %vm654_vm10 }
 0x2c8   :  { %v650_v31 = vsub.f32 1.0, %v649_v30  ;;  %v660_v30 = vor.u32 1.1754944e-38, %v659_v37 }
 0x2ca   :  { %v651_v39 = vmul.f32 %v1429_v12, %v650_v31  ;;  %v688_v31 = vrot.slane %v2102_v19, 4 }
 0x2cb   :  { %v2317_v13 = vpop.eup %1430 }
 0x2cc   :  { %v672_v44 = vmul.f32 %v2317_v13, %v2298_v57  ;;  %v652_v56 = vadd.f32 %v1429_v12, %v651_v39  ;;  %vm677_vm14 = vweird.f32 %v2317_v13 }
 0x2cd   :  { %vm678_vm0 = vmor %vm676_vm15, %vm677_vm14 }
 0x2ce   :  { %v673_v58 = vsub.f32 1.0, %v672_v44  ;;  %v656_v10 = vsel %vm655_vm12, %v1429_v12, %v652_v56 }
 0x2cf   :  { %v661_v47 = vsel %vm658_vm13, %v660_v30, %v656_v10  ;;  %v680_v10 = vand.u32 2147483647, %v2298_v57 }
 0x2d0   :  { %v687_v37 = vmul.f32 %v686_v6, %v661_v47  ;;  %v674_v19 = vmul.f32 %v2317_v13, %v673_v58  ;;  %v682_v6 = vand.u32 2147483648, %v2298_v57 }
 0x2d1   :  { %vm681_vm1 = vcmp.eq.f32.partialorder %v680_v10, 8.507059e+37 }
 0x2d2   :  { %v690_v12 = vadd.f32 %v688_v31, %v687_v37  ;;  %v675_v58 = vadd.f32 %v2317_v13, %v674_v19  ;;  %v683_v23 = vor.u32 1.1754944e-38, %v682_v6 }
 0x2d4   :  { %1432 = vtanh.f32 %v690_v12  ;;  %v679_v39 = vsel %vm678_vm0, %v2317_v13, %v675_v58 }
 0x2d5   :  { %v684_v44 = vsel %vm681_vm1, %v683_v23, %v679_v39 }
 0x2da   :  { %v1433_v53 = vpop.eup %1432 }
 0x2db   :  { %v692_v57 = vsub.f32 %v1977_v59, %v1433_v53  ;;  %v2510_v59 = vld [vmem:[#allocation5_spill] sm:$0xff] }
 0x2dd   :  { %v693_v13 = vmul.f32 %v692_v57, %v684_v44 }
 0x2df   :  { %v2371_v56 = vadd.f32 %v1433_v53, %v693_v13 }
 0x2e1   :  { %1375 = vst [vmem:[%s2501_s4 + $0x6] sm:$0x3] %v2371_v56  ;;  %764 = vmatmul.f32.vlgmr.msrb.gmra.mxu0 %v2371_v56  ;;  %784 = vmatmul.f32.vlgmr.msrb.gmra.mxu1 %v2371_v56 }
 0x2e2   :  { %804 = vmatmul.f32.vlgmr.msrb.gmra.mxu2 %v2371_v56  ;;  %1118 = vmatpush.msrb.mxu0 %v1999_v62 }
 0x2e3   :  { %1243 = vmatpush.msrb.mxu1 %v1989_v60  ;;  %1263 = vmatpush.msrb.mxu2 %v1994_v61  ;;  %v2511_v60 = vld [vmem:[#allocation4_spill] sm:$0xff]  ;;  %v1376_v61 = vld [vmem:[%s2500_s0 + $0x18] sm:$0x3f] }
 0x2e4   :  { %1119 = vmatpush.msrb.mxu0 %v2017_v1 }
 0x2e5   :  { %1244 = vmatpush.msrb.mxu1 %v2007_v63  ;;  %1264 = vmatpush.msrb.mxu2 %v2012_v0  ;;  %v2512_v63 = vld [vmem:[#allocation3_spill] sm:$0xff] }
 0x2e6   :  { %1120 = vmatpush.msrb.mxu0 %v2036_v4  ;;  %v699_v0 = vadd.f32 %v1376_v61, %v2512_v63 }
 0x2e7   :  { %1245 = vmatpush.msrb.mxu1 %v2026_v2  ;;  %1265 = vmatpush.msrb.mxu2 %v2031_v3 }
 0x2e8   :  { %1121 = vmatpush.msrb.mxu0 %v2055_v7  ;;  %v829_v2 = vrot.slane %v699_v0, 2 }
 0x2e9   :  { %1246 = vmatpush.msrb.mxu1 %v2045_v5  ;;  %1266 = vmatpush.msrb.mxu2 %v2511_v60 }
 0x2ea   :  { %1122 = vmatpush.msrb.mxu0 %v2510_v59 }
 0x2eb   :  { %1247 = vmatpush.msrb.mxu1 %v2064_v8  ;;  %1267 = vmatpush.msrb.mxu2 %v2069_v9 }
 0x2ec   :  { %1123 = vmatpush.msrb.mxu0 %v2096_v18 }
 0x2ed   :  { %1248 = vmatpush.msrb.mxu1 %v2086_v15  ;;  %1268 = vmatpush.msrb.mxu2 %v2091_v16 }
 0x2ee   :  { %1124 = vmatpush.msrb.mxu0 %v2118_v24 }
 0x2ef   :  { %1249 = vmatpush.msrb.mxu1 %v2108_v21  ;;  %1269 = vmatpush.msrb.mxu2 %v2113_v22 }
 0x2f0   :  { %1125 = vmatpush.msrb.mxu0 %v2137_v28 }
 0x2f1   :  { %1250 = vmatpush.msrb.mxu1 %v2127_v25  ;;  %1270 = vmatpush.msrb.mxu2 %v2132_v27 }
 0x2f2   :  { %1126 = vmatpush.msrb.mxu0 %v2157_v36 }
 0x2f3   :  { %1251 = vmatpush.msrb.mxu1 %v2147_v33  ;;  %1271 = vmatpush.msrb.mxu2 %v2152_v34 }
 0x2f4   :  { %1127 = vmatpush.msrb.mxu0 %v2177_v43 }
 0x2f5   :  { %1252 = vmatpush.msrb.mxu1 %v2167_v40  ;;  %1272 = vmatpush.msrb.mxu2 %v2172_v42 }
 0x2f6   :  { %1128 = vmatpush.msrb.mxu0 %v2196_v52 }
 0x2f7   :  { %1253 = vmatpush.msrb.mxu1 %v2186_v50  ;;  %1273 = vmatpush.msrb.mxu2 %v2191_v51 }
 0x2f8   :  { %1129 = vmatpush.msrb.mxu0 %v2215_v20 }
 0x2f9   :  { %1254 = vmatpush.msrb.mxu1 %v2205_v14  ;;  %1274 = vmatpush.msrb.mxu2 %v2210_v17 }
 0x2fa   :  { %1130 = vmatpush.msrb.mxu0 %v2234_v32 }
 0x2fb   :  { %1255 = vmatpush.msrb.mxu1 %v2224_v26  ;;  %1275 = vmatpush.msrb.mxu2 %v2229_v29 }
 0x2fc   :  { %1131 = vmatpush.msrb.mxu0 %v2252_v41 }
 0x2fd   :  { %1256 = vmatpush.msrb.mxu1 %v2242_v35  ;;  %1276 = vmatpush.msrb.mxu2 %v2247_v38 }
 0x2fe   :  { %1132 = vmatpush.msrb.mxu0 %v2271_v48 }
 0x2ff   :  { %1257 = vmatpush.msrb.mxu1 %v2258_v45  ;;  %1277 = vmatpush.msrb.mxu2 %v2263_v46 }
 0x300   :  { %1133 = vmatpush.msrb.mxu0 %v2290_v55 }
 0x301   :  { %1258 = vmatpush.msrb.mxu1 %v2277_v49  ;;  %1278 = vmatpush.msrb.mxu2 %v2282_v54  ;;  %v853_v49 = vrot.slane %v699_v0, 4 }
 0x35e   :  { %v765_v3 = vpop.f32.mrf.mxu0  ;;  %v785_v5 = vpop.f32.mrf.mxu1 }
 0x35f   :  { %v808_v8 = vadd.f32 %v765_v3, %v699_v0  ;;  %v831_v9 = vadd.f32 %v829_v2, %v785_v5 }
 0x361   :  { %v1377_v15 = vmul.f32 -1.442695, %v808_v8  ;;  %v1378_v16 = vmul.f32 -1.442695, %v831_v9  ;;  %v2474_v8 = vld [vmem:[%s2498_s3] ss:$0 sm:$0xff] }
 0x363   :  { %1434 = vpow2.f32 %v1377_v15 }
 0x364   :  { %1436 = vpow2.f32 %v1378_v16 }
 0x365   :  { %v805_v26 = vpop.f32.mrf.mxu2 }
 0x366   :  { %v851_v46 = vadd.f32 %v1934_v11, %v805_v26 }
 0x369   :  { %v1435_v21 = vpop.eup %1434 }
 0x36a   :  { %v1437_v22 = vpop.eup %1436  ;;  %v812_v25 = vadd.f32 1.0, %v1435_v21 }
 0x36b   :  { %v835_v27 = vadd.f32 1.0, %v1437_v22 }
 0x36c   :  { %1438 = vrcp.f32 %v812_v25  ;;  %v824_v51 = vand.u32 2147483648, %v812_v25  ;;  %v822_v17 = vand.u32 2147483647, %v812_v25  ;;  %vm818_vm3 = vweird.f32 %v812_v25 }
 0x36d   :  { %1440 = vrcp.f32 %v835_v27  ;;  %v847_v19 = vand.u32 2147483648, %v835_v27  ;;  %vm841_vm7 = vweird.f32 %v835_v27  ;;  %v845_v12 = vand.u32 2147483647, %v835_v27 }
 0x36e   :  { %v825_v38 = vor.u32 1.1754944e-38, %v824_v51  ;;  %vm823_vm5 = vcmp.eq.f32.partialorder %v822_v17, 8.507059e+37 }
 0x36f   :  { %v848_v10 = vor.u32 1.1754944e-38, %v847_v19  ;;  %vm846_vm9 = vcmp.eq.f32.partialorder %v845_v12, 8.507059e+37 }
 0x372   :  { %v1439_v33 = vpop.eup %1438 }
 0x373   :  { %v1441_v34 = vpop.eup %1440  ;;  %v814_v40 = vmul.f32 %v1439_v33, %v812_v25  ;;  %vm819_vm2 = vweird.f32 %v1439_v33 }
 0x374   :  { %v837_v50 = vmul.f32 %v1441_v34, %v835_v27  ;;  %vm820_vm4 = vmor %vm818_vm3, %vm819_vm2  ;;  %vm842_vm6 = vweird.f32 %v1441_v34 }
 0x375   :  { %v815_v42 = vsub.f32 1.0, %v814_v40  ;;  %vm843_vm8 = vmor %vm841_vm7, %vm842_vm6 }
 0x376   :  { %v838_v35 = vsub.f32 1.0, %v837_v50 }
 0x377   :  { %v816_v14 = vmul.f32 %v1439_v33, %v815_v42 }
 0x378   :  { %v839_v31 = vmul.f32 %v1441_v34, %v838_v35 }
 0x379   :  { %v817_v29 = vadd.f32 %v1439_v33, %v816_v14 }
 0x37a   :  { %v840_v37 = vadd.f32 %v1441_v34, %v839_v31 }
 0x37b   :  { %v821_v45 = vsel %vm820_vm4, %v1439_v33, %v817_v29  ;;  %v1384_v29 = vld [vmem:[%s2500_s0 + $0x24] sm:$0x3f] }
 0x37c   :  { %v826_v54 = vsel %vm823_vm5, %v825_v38, %v821_v45  ;;  %v844_v58 = vsel %vm843_vm8, %v1441_v34, %v840_v37  ;;  %v1029_v35 = vadd.f32 %v1384_v29, %v2512_v63 }
 0x37d   :  { %v852_v30 = vmul.f32 %v851_v46, %v826_v54  ;;  %v849_v53 = vsel %vm846_vm9, %v848_v10, %v844_v58 }
 0x37e   :  { %v1159_v38 = vrot.slane %v1029_v35, 2 }
 0x37f   :  { %v855_v47 = vadd.f32 %v853_v49, %v852_v30 }
 0x381   :  { %1442 = vtanh.f32 %v855_v47 }
 0x387   :  { %v1443_v6 = vpop.eup %1442 }
 0x388   :  { %v857_v39 = vsub.f32 %v2371_v56, %v1443_v6 }
 0x38a   :  { %v858_v11 = vmul.f32 %v857_v39, %v849_v53 }
 0x38c   :  { %v2442_v23 = vadd.f32 %v1443_v6, %v858_v11 }
 0x38e   :  { %1379 = vst [vmem:[%s2501_s4 + $0x8] sm:$0x3] %v2442_v23  ;;  %929 = vmatmul.f32.vlgmr.msrb.gmra.mxu3 %v2442_v23  ;;  %949 = vmatmul.f32.vlgmr.msra.gmra.mxu0 %v2442_v23 }
 0x38f   :  { %969 = vmatmul.f32.vlgmr.msra.gmra.mxu1 %v2442_v23  ;;  %1283 = vmatpush.msrb.mxu3 %v1999_v62  ;;  %v1380_v62 = vld [vmem:[%s2500_s0 + $0x1e] sm:$0x3f] }
 0x391   :  { %1284 = vmatpush.msrb.mxu3 %v2017_v1  ;;  %v864_v1 = vadd.f32 %v1380_v62, %v2512_v63 }
 0x393   :  { %1285 = vmatpush.msrb.mxu3 %v2036_v4  ;;  %v994_v4 = vrot.slane %v864_v1, 2  ;;  %v1018_v5 = vrot.slane %v864_v1, 4 }
 0x395   :  { %1286 = vmatpush.msrb.mxu3 %v2055_v7 }
 0x397   :  { %1287 = vmatpush.msrb.mxu3 %v2510_v59 }
 0x399   :  { %1288 = vmatpush.msrb.mxu3 %v2096_v18 }
 0x39b   :  { %1289 = vmatpush.msrb.mxu3 %v2118_v24 }
 0x39d   :  { %1290 = vmatpush.msrb.mxu3 %v2137_v28 }
 0x39f   :  { %1291 = vmatpush.msrb.mxu3 %v2157_v36 }
 0x3a1   :  { %1292 = vmatpush.msrb.mxu3 %v2177_v43 }
 0x3a3   :  { %1293 = vmatpush.msrb.mxu3 %v2196_v52 }
 0x3a5   :  { %1294 = vmatpush.msrb.mxu3 %v2215_v20 }
 0x3a7   :  { %1295 = vmatpush.msrb.mxu3 %v2234_v32 }
 0x3a9   :  { %1296 = vmatpush.msrb.mxu3 %v2252_v41 }
 0x3ab   :  { %1297 = vmatpush.msrb.mxu3 %v2271_v48 }
 0x3ad   :  { %1298 = vmatpush.msrb.mxu3 %v2290_v55 }
 0x40b   :  { %v950_v7 = vpop.f32.mrf.mxu0 }
 0x40c   :  { %v996_v18 = vadd.f32 %v994_v4, %v950_v7  ;;  %v970_v61 = vpop.f32.mrf.mxu1 }
 0x40d   :  { %v1016_v9 = vadd.f32 %v2474_v8, %v970_v61 }
 0x40e   :  { %v1382_v24 = vmul.f32 -1.442695, %v996_v18 }
 0x410   :  { %1444 = vpow2.f32 %v1382_v24 }
 0x411   :  { %v930_v28 = vpop.f32.mrf.mxu3 }
 0x412   :  { %v973_v36 = vadd.f32 %v930_v28, %v864_v1 }
 0x414   :  { %v1381_v43 = vmul.f32 -1.442695, %v973_v36  ;;  %v1183_v36 = vrot.slane %v1029_v35, 4 }
 0x416   :  { %1446 = vpow2.f32 %v1381_v43  ;;  %v1445_v52 = vpop.eup %1444 }
 0x417   :  { %v1000_v32 = vadd.f32 1.0, %v1445_v52 }
 0x419   :  { %v1012_v33 = vand.u32 2147483648, %v1000_v32  ;;  %vm1006_vm15 = vweird.f32 %v1000_v32  ;;  %v1010_v34 = vand.u32 2147483647, %v1000_v32 }
 0x41b   :  { %v1013_v50 = vor.u32 1.1754944e-38, %v1012_v33  ;;  %vm1011_vm1 = vcmp.eq.f32.partialorder %v1010_v34, 8.507059e+37 }
 0x41c   :  { %v1447_v20 = vpop.eup %1446 }
 0x41d   :  { %v977_v41 = vadd.f32 1.0, %v1447_v20 }
 0x41f   :  { %1448 = vrcp.f32 %v977_v41  ;;  %v989_v56 = vand.u32 2147483648, %v977_v41  ;;  %v987_v60 = vand.u32 2147483647, %v977_v41  ;;  %vm983_vm11 = vweird.f32 %v977_v41 }
 0x420   :  { %1450 = vrcp.f32 %v1000_v32 }
 0x421   :  { %v990_v3 = vor.u32 1.1754944e-38, %v989_v56  ;;  %vm988_vm13 = vcmp.eq.f32.partialorder %v987_v60, 8.507059e+37 }
 0x425   :  { %v1449_v48 = vpop.eup %1448 }
 0x426   :  { %v1451_v55 = vpop.eup %1450  ;;  %v979_v57 = vmul.f32 %v1449_v48, %v977_v41  ;;  %vm984_vm10 = vweird.f32 %v1449_v48 }
 0x427   :  { %v1002_v13 = vmul.f32 %v1451_v55, %v1000_v32  ;;  %vm985_vm12 = vmor %vm983_vm11, %vm984_vm10  ;;  %vm1007_vm14 = vweird.f32 %v1451_v55 }
 0x428   :  { %v980_v44 = vsub.f32 1.0, %v979_v57  ;;  %vm1008_vm0 = vmor %vm1006_vm15, %vm1007_vm14 }
 0x429   :  { %v1003_v2 = vsub.f32 1.0, %v1002_v13 }
 0x42a   :  { %v981_v59 = vmul.f32 %v1449_v48, %v980_v44 }
 0x42b   :  { %v1004_v22 = vmul.f32 %v1451_v55, %v1003_v2 }
 0x42c   :  { %v982_v0 = vadd.f32 %v1449_v48, %v981_v59 }
 0x42d   :  { %v1005_v27 = vadd.f32 %v1451_v55, %v1004_v22 }
 0x42e   :  { %v986_v15 = vsel %vm985_vm12, %v1449_v48, %v982_v0  ;;  %v1388_v0 = vld [vmem:[%s2500_s0 + $0x2a] sm:$0x3f] }
 0x42f   :  { %v991_v16 = vsel %vm988_vm13, %v990_v3, %v986_v15  ;;  %v1009_v40 = vsel %vm1008_vm0, %v1451_v55, %v1005_v27  ;;  %v1194_v2 = vadd.f32 %v1388_v0, %v2512_v63 }
 0x430   :  { %v1017_v21 = vmul.f32 %v1016_v9, %v991_v16  ;;  %v1014_v14 = vsel %vm1011_vm1, %v1013_v50, %v1009_v40 }
 0x431   :  { %v1324_v15 = vrot.slane %v1194_v2, 2 }
 0x432   :  { %v1020_v25 = vadd.f32 %v1018_v5, %v1017_v21 }
 0x434   :  { %1452 = vtanh.f32 %v1020_v25 }
 0x43a   :  { %v1453_v42 = vpop.eup %1452 }
 0x43b   :  { %v1022_v51 = vsub.f32 %v2442_v23, %v1453_v42 }
 0x43d   :  { %v1023_v17 = vmul.f32 %v1022_v51, %v1014_v14 }
 0x43f   :  { %v1024_v26 = vadd.f32 %v1453_v42, %v1023_v17 }
 0x441   :  { %1383 = vst [vmem:[%s2501_s4 + $0xa] sm:$0x3] %v1024_v26  ;;  %1094 = vmatmul.f32.vlgmr.msra.gmra.mxu2 %v1024_v26  ;;  %1114 = vmatmul.f32.vlgmr.msra.gmra.mxu3 %v1024_v26 }
 0x442   :  { %1134 = vmatmul.f32.vlgmr.msrb.gmra.mxu0 %v1024_v26 }
 0x4bf   :  { %v1135_v1 = vpop.f32.mrf.mxu0 }
 0x4c0   :  { %v1181_v24 = vadd.f32 %v2474_v8, %v1135_v1 }
 0x4c4   :  { %v1095_v45 = vpop.f32.mrf.mxu2  ;;  %v1115_v46 = vpop.f32.mrf.mxu3 }
 0x4c5   :  { %v1138_v49 = vadd.f32 %v1095_v45, %v1029_v35  ;;  %v1161_v54 = vadd.f32 %v1159_v38, %v1115_v46  ;;  %v1348_v45 = vrot.slane %v1194_v2, 4 }
 0x4c7   :  { %v1385_v30 = vmul.f32 -1.442695, %v1138_v49  ;;  %v1386_v31 = vmul.f32 -1.442695, %v1161_v54 }
 0x4c9   :  { %1454 = vpow2.f32 %v1385_v30 }
 0x4ca   :  { %1456 = vpow2.f32 %v1386_v31 }
 0x4cf   :  { %v1455_v47 = vpop.eup %1454 }
 0x4d0   :  { %v1457_v37 = vpop.eup %1456  ;;  %v1142_v19 = vadd.f32 1.0, %v1455_v47 }
 0x4d1   :  { %v1165_v12 = vadd.f32 1.0, %v1457_v37 }
 0x4d2   :  { %1458 = vrcp.f32 %v1142_v19  ;;  %v1154_v53 = vand.u32 2147483648, %v1142_v19  ;;  %v1152_v62 = vand.u32 2147483647, %v1142_v19  ;;  %vm1148_vm3 = vweird.f32 %v1142_v19 }
 0x4d3   :  { %1460 = vrcp.f32 %v1165_v12  ;;  %v1177_v48 = vand.u32 2147483648, %v1165_v12  ;;  %vm1171_vm7 = vweird.f32 %v1165_v12  ;;  %v1175_v55 = vand.u32 2147483647, %v1165_v12 }
 0x4d4   :  { %v1155_v7 = vor.u32 1.1754944e-38, %v1154_v53  ;;  %vm1153_vm5 = vcmp.eq.f32.partialorder %v1152_v62, 8.507059e+37 }
 0x4d5   :  { %v1178_v13 = vor.u32 1.1754944e-38, %v1177_v48  ;;  %vm1176_vm9 = vcmp.eq.f32.partialorder %v1175_v55, 8.507059e+37 }
 0x4d8   :  { %v1459_v58 = vpop.eup %1458 }
 0x4d9   :  { %v1461_v6 = vpop.eup %1460  ;;  %v1144_v10 = vmul.f32 %v1459_v58, %v1142_v19  ;;  %vm1149_vm2 = vweird.f32 %v1459_v58 }
 0x4da   :  { %v1167_v11 = vmul.f32 %v1461_v6, %v1165_v12  ;;  %vm1150_vm4 = vmor %vm1148_vm3, %vm1149_vm2  ;;  %vm1172_vm6 = vweird.f32 %v1461_v6 }
 0x4db   :  { %v1145_v39 = vsub.f32 1.0, %v1144_v10  ;;  %vm1173_vm8 = vmor %vm1171_vm7, %vm1172_vm6 }
 0x4dc   :  { %v1168_v18 = vsub.f32 1.0, %v1167_v11 }
 0x4dd   :  { %v1146_v23 = vmul.f32 %v1459_v58, %v1145_v39 }
 0x4de   :  { %v1169_v20 = vmul.f32 %v1461_v6, %v1168_v18 }
 0x4df   :  { %v1147_v4 = vadd.f32 %v1459_v58, %v1146_v23 }
 0x4e0   :  { %v1170_v41 = vadd.f32 %v1461_v6, %v1169_v20 }
 0x4e1   :  { %v1151_v28 = vsel %vm1150_vm4, %v1459_v58, %v1147_v4 }
 0x4e2   :  { %v1156_v43 = vsel %vm1153_vm5, %v1155_v7, %v1151_v28  ;;  %v1174_v57 = vsel %vm1173_vm8, %v1461_v6, %v1170_v41 }
 0x4e3   :  { %v1182_v52 = vmul.f32 %v1181_v24, %v1156_v43  ;;  %v1179_v59 = vsel %vm1176_vm9, %v1178_v13, %v1174_v57 }
 0x4e5   :  { %v1185_v32 = vadd.f32 %v1183_v36, %v1182_v52 }
 0x4e7   :  { %1462 = vtanh.f32 %v1185_v32 }
 0x4ed   :  { %v1463_v44 = vpop.eup %1462 }
 0x4ee   :  { %v1187_v56 = vsub.f32 %v1024_v26, %v1463_v44 }
 0x4f0   :  { %v1188_v60 = vmul.f32 %v1187_v56, %v1179_v59 }
 0x4f2   :  { %v1189_v61 = vadd.f32 %v1463_v44, %v1188_v60 }
 0x4f4   :  { %1387 = vst [vmem:[%s2501_s4 + $0xc] sm:$0x3] %v1189_v61  ;;  %1259 = vmatmul.f32.vlgmr.msrb.gmra.mxu1 %v1189_v61  ;;  %1279 = vmatmul.f32.vlgmr.msrb.gmra.mxu2 %v1189_v61 }
 0x4f5   :  { %1299 = vmatmul.f32.vlgmr.msrb.gmra.mxu3 %v1189_v61 }
 0x571   :  { %v1260_v3 = vpop.f32.mrf.mxu1 }
 0x572   :  { %v1303_v5 = vadd.f32 %v1260_v3, %v1194_v2 }
 0x574   :  { %v1389_v9 = vmul.f32 -1.442695, %v1303_v5 }
 0x576   :  { %1464 = vpow2.f32 %v1389_v9 }
 0x577   :  { %v1280_v16 = vpop.f32.mrf.mxu2 }
 0x578   :  { %v1326_v21 = vadd.f32 %v1324_v15, %v1280_v16  ;;  %v1300_v26 = vpop.f32.mrf.mxu3 }
 0x579   :  { %v1346_v54 = vadd.f32 %v2474_v8, %v1300_v26 }
 0x57a   :  { %v1390_v22 = vmul.f32 -1.442695, %v1326_v21 }
 0x57c   :  { %v1465_v25 = vpop.eup %1464  ;;  %1466 = vpow2.f32 %v1390_v22 }
 0x57d   :  { %v1307_v27 = vadd.f32 1.0, %v1465_v25 }
 0x57f   :  { %1468 = vrcp.f32 %v1307_v27  ;;  %v1319_v51 = vand.u32 2147483648, %v1307_v27  ;;  %v1317_v14 = vand.u32 2147483647, %v1307_v27  ;;  %vm1313_vm11 = vweird.f32 %v1307_v27 }
 0x581   :  { %v1320_v38 = vor.u32 1.1754944e-38, %v1319_v51  ;;  %vm1318_vm13 = vcmp.eq.f32.partialorder %v1317_v14, 8.507059e+37 }
 0x582   :  { %v1467_v33 = vpop.eup %1466 }
 0x583   :  { %v1330_v34 = vadd.f32 1.0, %v1467_v33 }
 0x585   :  { %v1469_v40 = vpop.eup %1468  ;;  %1470 = vrcp.f32 %v1330_v34  ;;  %v1342_v12 = vand.u32 2147483648, %v1330_v34  ;;  %vm1336_vm15 = vweird.f32 %v1330_v34  ;;  %v1340_v58 = vand.u32 2147483647, %v1330_v34 }
 0x586   :  { %v1309_v42 = vmul.f32 %v1469_v40, %v1307_v27  ;;  %vm1314_vm10 = vweird.f32 %v1469_v40 }
 0x587   :  { %vm1315_vm12 = vmor %vm1313_vm11, %vm1314_vm10  ;;  %v1343_v39 = vor.u32 1.1754944e-38, %v1342_v12  ;;  %vm1341_vm1 = vcmp.eq.f32.partialorder %v1340_v58, 8.507059e+37 }
 0x588   :  { %v1310_v50 = vsub.f32 1.0, %v1309_v42 }
 0x58a   :  { %v1311_v63 = vmul.f32 %v1469_v40, %v1310_v50 }
 0x58b   :  { %v1471_v17 = vpop.eup %1470 }
 0x58c   :  { %v1332_v29 = vmul.f32 %v1471_v17, %v1330_v34  ;;  %v1312_v35 = vadd.f32 %v1469_v40, %v1311_v63  ;;  %vm1337_vm14 = vweird.f32 %v1471_v17 }
 0x58d   :  { %vm1338_vm0 = vmor %vm1336_vm15, %vm1337_vm14 }
 0x58e   :  { %v1333_v46 = vsub.f32 1.0, %v1332_v29  ;;  %v1316_v49 = vsel %vm1315_vm12, %v1469_v40, %v1312_v35 }
 0x58f   :  { %v1321_v30 = vsel %vm1318_vm13, %v1320_v38, %v1316_v49 }
 0x590   :  { %v1347_v31 = vmul.f32 %v1346_v54, %v1321_v30  ;;  %v1334_v47 = vmul.f32 %v1471_v17, %v1333_v46 }
 0x592   :  { %v1350_v37 = vadd.f32 %v1348_v45, %v1347_v31  ;;  %v1335_v19 = vadd.f32 %v1471_v17, %v1334_v47 }
 0x594   :  { %1472 = vtanh.f32 %v1350_v37  ;;  %v1339_v6 = vsel %vm1338_vm0, %v1471_v17, %v1335_v19 }
 0x595   :  { %v1344_v11 = vsel %vm1341_vm1, %v1343_v39, %v1339_v6 }
 0x59a   :  { %v1473_v10 = vpop.eup %1472 }
 0x59b   :  { %v1352_v53 = vsub.f32 %v1189_v61, %v1473_v10 }
 0x59d   :  { %v1353_v23 = vmul.f32 %v1352_v53, %v1344_v11 }
 0x59f   :  { %v1354_v62 = vadd.f32 %v1473_v10, %v1353_v23 }
 0x5a1   :  { %1391 = vst [vmem:[%s2501_s4 + $0xe] sm:$0x3] %v1354_v62 }
 0x5a2   :  { %1357 = vst [vmem:[#allocation2] sm:$0x3] %v1354_v62 }

</bundles_post_ra>
